<compile_context>
chip_gen: v7x
topology: tpu7x:2x2x1
jax: 0.10.0
libtpu: 0.0.40
codegen_flags: <defaults>
</compile_context>

<pallas_src>
import functools

import jax
import jax.numpy as jnp
from jax.experimental import pallas as pl
from jax.experimental.pallas import tpu as pltpu


def _probe_roll_is_jnp():
    """Probe pltpu.roll's direction once at import: jnp convention <=> out[i] = x[i - shift]."""

    def probe(x_ref, o_ref):
        o_ref[...] = pltpu.roll(x_ref[...], shift=1, axis=1)

    try:
        x = jax.lax.broadcasted_iota(jnp.float32, (8, 128), 1)
        y = pl.pallas_call(
            probe, out_shape=jax.ShapeDtypeStruct((8, 128), jnp.float32))(x)
        return bool(jax.device_get(y)[0, 0] == 127.0)
    except Exception:
        return True  # conservative default: jnp.roll semantics


_ROLL_IS_JNP = _probe_roll_is_jnp()


def _rope_kernel(cos_ref, sin_ref, q_ref, k_ref, qo_ref, ko_ref, *,
                 shift_fwd, shift_bwd, half, seg, fold, single_roll):
    """One grid step: (block_rows, lane) tiles of q and k, resident f32 tables."""
    cos = cos_ref[...]
    s = sin_ref[...]  # sign-folded sin: -sin on low half, +sin on high half, 0 on pad lanes

    if single_roll:
        # Head dim == lane and unpadded: roll by exactly half the lane width is
        # direction-agnostic, and the signed table picks the right sign.
        def rotate(x_ref, o_ref):
            x = x_ref[...].astype(jnp.float32)
            xr = pltpu.roll(x, shift=shift_bwd, axis=1)
            o_ref[...] = (x * cos + xr * s).astype(o_ref.dtype)
    else:
        lane = q_ref.shape[1]
        # Hoisted lane mask (built once, shared by q and k): low half of every
        # Dp-wide segment takes the "forward" (d+half) source, high half the
        # "backward" (d-half) source.
        lane_ids = jax.lax.broadcasted_iota(jnp.int32, (1, lane), 1)
        pos = (lane_ids & (seg - 1)) if fold > 1 else lane_ids  # seg is pow2 when fold > 1
        mask_lo = pos < half

        def rotate(x_ref, o_ref):
            x = x_ref[...].astype(jnp.float32)
            x_fwd = pltpu.roll(x, shift=shift_fwd, axis=1)  # lane i <- x[(i + half) % lane]
            x_bwd = pltpu.roll(x, shift=shift_bwd, axis=1)  # lane i <- x[(i - half) % lane]
            rot = jnp.where(mask_lo, x_fwd, x_bwd)
            o_ref[...] = (x * cos + rot * s).astype(o_ref.dtype)

    rotate(q_ref, qo_ref)
    rotate(k_ref, ko_ref)


@functools.lru_cache(maxsize=16)
def _rope_tables(T_pad, D, Dp, lane, G):
    """cos / sign-folded-sin tables, folded to (G*rows, lane); built once per config."""
    half = D // 2
    fold = lane // Dp
    rows = T_pad // fold
    inv_freq = 1.0 / (10000.0 ** (jnp.arange(0, D, 2, dtype=jnp.float32) / D))
    t = jnp.arange(T_pad, dtype=jnp.float32)
    freqs = t[:, None] * inv_freq[None, :]                 # (T_pad, D/2)
    emb = jnp.concatenate([freqs, freqs], axis=-1)         # (T_pad, D)
    cos = jnp.cos(emb)
    sign = jnp.where(jnp.arange(D) < half, -1.0, 1.0)
    sin_signed = jnp.sin(emb) * sign
    if Dp > D:                                             # zero the pad lanes
        pad = ((0, 0), (0, Dp - D))
        cos = jnp.pad(cos, pad)
        sin_signed = jnp.pad(sin_signed, pad)
    cos = cos.reshape(rows, lane)
    sin_signed = sin_signed.reshape(rows, lane)
    if G > 1:
        cos = jnp.tile(cos, (G, 1))
        sin_signed = jnp.tile(sin_signed, (G, 1))
    return cos, sin_signed


def _pick_tiles(n_heads, rows_per_head, lane, itemsize, max_tile_bytes=2 << 20):
    """Pick (head_group G, row_tile R). rows_per_head is a multiple of 8."""
    sub = 8 * max(1, 4 // itemsize)        # preferred sublane multiple (8 f32 / 16 bf16 / 32 int8)
    row_bytes = lane * itemsize

    if rows_per_head * row_bytes <= max_tile_bytes:
        # A whole head's rows fit the budget: group G heads per block.
        R = rows_per_head
        divisors = [g for g in range(1, n_heads + 1) if n_heads % g == 0]
        fits = [g for g in divisors if g * R * row_bytes <= max_tile_bytes]
        best = max(fits)                    # g == 1 always fits here
        if (n_heads // best) % 2:           # megacore: prefer an even grid (<= 2x smaller tile)
            even = [g for g in fits if (n_heads // g) % 2 == 0 and 2 * g >= best]
            if even:
                best = max(even)
        return best, R

    # Huge per-head slab: keep one head per block and tile the row axis.
    divisors = [r for r in range(1, rows_per_head + 1) if rows_per_head % r == 0]
    legal = [r for r in divisors if r % 8 == 0]            # keeps the (8,128) block rule
    pref = [r for r in legal if r % sub == 0 and r * row_bytes <= max_tile_bytes]
    if pref:
        return 1, max(pref)
    fit = [r for r in legal if r * row_bytes <= max_tile_bytes]
    if fit:
        return 1, max(fit)
    return 1, min(legal)  # TODO(synk): pathological row counts; tile may exceed the byte target


def rope_forward(q, k):
    """Pallas equivalent of RoPE.forward(q, k); q, k: (B, H, T, D)."""
    assert q.shape == k.shape and q.dtype == k.dtype
    B, H, T, D = q.shape
    assert D % 2 == 0, "RoPE head dim must be even"
    half = D // 2
    n_heads = B * H

    # --- lane-dense layout: pad the head dim to Dp so the 128-lane axis is
    # always fully dense, folding fold = lane // Dp sequence positions per row.
    if D % 128 == 0:
        Dp = D
    elif D < 128:
        Dp = 1 << (D - 1).bit_length()        # next pow2 -> divides 128
    else:
        Dp = ((D + 127) // 128) * 128
    lane = Dp if Dp % 128 == 0 else 128
    fold = lane // Dp
    # Pad T so rows_per_head is a multiple of 8 (sublane rule) and of fold.
    T_pad = -(-T // (8 * fold)) * (8 * fold)
    rows_per_head = T_pad // fold

    q_p, k_p = q, k
    if (T_pad, Dp) != (T, D):
        pad_cfg = ((0, 0), (0, 0), (0, T_pad - T), (0, Dp - D))
        q_p = jnp.pad(q, pad_cfg)
        k_p = jnp.pad(k, pad_cfg)

    qf = q_p.reshape(n_heads * rows_per_head, lane)
    kf = k_p.reshape(n_heads * rows_per_head, lane)

    itemsize = jnp.dtype(q.dtype).itemsize
    G, R = _pick_tiles(n_heads, rows_per_head, lane, itemsize)
    row_tiles = rows_per_head // R
    heads_blocks = n_heads // G
    grid = (row_tiles, heads_blocks)          # heads iterate fastest -> table index constant
    BR = G * R

    cos_t, sin_t = _rope_tables(T_pad, D, Dp, lane, G)

    single_roll = (fold == 1 and Dp == D)
    if single_roll:
        shift_fwd = shift_bwd = half
    elif _ROLL_IS_JNP:
        shift_fwd, shift_bwd = (lane - half) % lane, half
    else:
        shift_fwd, shift_bwd = half, (lane - half) % lane

    kernel = functools.partial(
        _rope_kernel, shift_fwd=shift_fwd, shift_bwd=shift_bwd,
        half=half, seg=Dp, fold=fold, single_roll=single_roll)

    data_tile = BR * lane * itemsize
    table_tile = BR * lane * 4
    vmem_limit = int(min(max(8 * data_tile + 4 * table_tile + (4 << 20), 32 << 20), 48 << 20))

    out_shapes = (
        jax.ShapeDtypeStruct(qf.shape, q.dtype),
        jax.ShapeDtypeStruct(kf.shape, k.dtype),
    )

    def call(single_buffer_tables):
        data_spec = pl.BlockSpec((BR, lane), lambda j, i: (i * row_tiles + j, 0))
        if single_buffer_tables:
            table_spec = pl.BlockSpec((BR, lane), lambda j, i: (j, 0),
                                      pipeline_mode=pl.Buffered(1))
        else:
            table_spec = pl.BlockSpec((BR, lane), lambda j, i: (j, 0))
        return pl.pallas_call(
            kernel,
            out_shape=out_shapes,
            grid_spec=pltpu.PrefetchScalarGridSpec(
                num_scalar_prefetch=0,
                grid=grid,
                in_specs=[table_spec, table_spec, data_spec, data_spec],
                out_specs=[data_spec, data_spec],
            ),
            compiler_params=pltpu.CompilerParams(
                dimension_semantics=("parallel", "parallel"),
                vmem_limit_bytes=vmem_limit,
            ),
        )(cos_t, sin_t, qf, kf)

    if row_tiles == 1:
        # Tables are constant across the grid: single-buffer them; fall back to
        # default double-buffering if this Pallas build rejects Buffered(1).
        try:
            qo, ko = call(True)
        except Exception:
            qo, ko = call(False)
    else:
        qo, ko = call(False)

    qo = qo.reshape(B, H, T_pad, Dp)
    ko = ko.reshape(B, H, T_pad, Dp)
    if (T_pad, Dp) != (T, D):
        qo = qo[:, :, :T, :D]
        ko = ko[:, :, :T, :D]
    return qo, ko


def rope_reference(q, k):
    """Pure-JAX reference mirroring the PyTorch module exactly."""
    B, H, T, D = q.shape
    inv_freq = 1.0 / (10000.0 ** (jnp.arange(0, D, 2, dtype=jnp.float32) / D))
    t = jnp.arange(T, dtype=jnp.float32)
    freqs = jnp.einsum('i,j->ij', t, inv_freq)
    emb = jnp.concatenate([freqs, freqs], axis=-1)
    cos = jnp.cos(emb)[None, None, :, :]
    sin = jnp.sin(emb)[None, None, :, :]

    def rotate_half(x):
        x1 = x[..., : x.shape[-1] // 2]
        x2 = x[..., x.shape[-1] // 2:]
        return jnp.concatenate([-x2, x1], axis=-1)

    def apply(x):
        return x * cos + rotate_half(x * sin)

    return apply(q), apply(k)


if __name__ == "__main__":
    key = jax.random.PRNGKey(0)
    kq, kk = jax.random.split(key)
    B, H, T, D = 2, 4, 8, 32
    q = jax.random.normal(kq, (B, H, T, D), dtype=jnp.float32)
    k = jax.random.normal(kk, (B, H, T, D), dtype=jnp.float32)

    q_out, k_out = rope_forward(q, k)
    jax.block_until_ready((q_out, k_out))

    q_ref, k_ref = rope_reference(q, k)
    assert q_out.shape == q_ref.shape and k_out.shape == k_ref.shape
    assert jnp.allclose(q_out, q_ref, atol=1e-5, rtol=1e-5)
    assert jnp.allclose(k_out, k_ref, atol=1e-5, rtol=1e-5)
    print("KERNEL_OK")
</pallas_src>

<mosaic_0001>
module attributes {stable_mosaic.version = 11 : i64} {
  func.func @probe(%arg0: memref<8x128xf32, #tpu.memory_space<vmem>>, %arg1: memref<8x128xf32, #tpu.memory_space<vmem>>) attributes {dimension_semantics = [], scalar_prefetch = 0 : i64, scratch_operands = 0 : i64, tpu.core_type = #tpu.core_type<tc>} {
    %c0 = arith.constant 0 : index
    %c0_0 = arith.constant 0 : index
    %0 = vector.load %arg0[%c0, %c0_0] : memref<8x128xf32, #tpu.memory_space<vmem>>, vector<8x128xf32>
    %c1_i32 = arith.constant 1 : i32
    %1 = tpu.dynamic_rotate %0 by %c1_i32 dim 1 : vector<8x128xf32>, i32 -> vector<8x128xf32>
    %c0_1 = arith.constant 0 : index
    %c0_2 = arith.constant 0 : index
    %2 = vector.load %arg1[%c0_1, %c0_2] : memref<8x128xf32, #tpu.memory_space<vmem>>, vector<8x128xf32>
    tpu.vector_store %arg1[%c0_1, %c0_2], %1 {strides = array<i32>} : memref<8x128xf32, #tpu.memory_space<vmem>>, vector<8x128xf32>,
    return
  }
}

module attributes {stable_mosaic.version = 11 : i64} {
  func.func @_rope_kernel(%arg0: i32, %arg1: i32, %arg2: memref<32x128xf32, #tpu.memory_space<vmem>>, %arg3: memref<32x128xf32, #tpu.memory_space<vmem>>, %arg4: memref<32x128xf32, #tpu.memory_space<vmem>>, %arg5: memref<32x128xf32, #tpu.memory_space<vmem>>, %arg6: memref<32x128xf32, #tpu.memory_space<vmem>>, %arg7: memref<32x128xf32, #tpu.memory_space<vmem>>) attributes {dimension_semantics = [#tpu.dimension_semantics<parallel>, #tpu.dimension_semantics<parallel>], iteration_bounds = array<i64: 1, 2>, scalar_prefetch = 0 : i64, scratch_operands = 0 : i64, tpu.core_type = #tpu.core_type<tc>, window_params = [{pipeline_mode = #tpu.pipeline_mode<synchronous>, transform_indices = @transform_0, window_bounds = array<i64: 32, 128>}, {pipeline_mode = #tpu.pipeline_mode<synchronous>, transform_indices = @transform_1, window_bounds = array<i64: 32, 128>}, {transform_indices = @transform_2, window_bounds = array<i64: 32, 128>}, {transform_indices = @transform_3, window_bounds = array<i64: 32, 128>}, {transform_indices = @transform_4, window_bounds = array<i64: 32, 128>}, {transform_indices = @transform_5, window_bounds = array<i64: 32, 128>}]} {
    %c0 = arith.constant 0 : index
    %c0_0 = arith.constant 0 : index
    %0 = vector.load %arg2[%c0, %c0_0] : memref<32x128xf32, #tpu.memory_space<vmem>>, vector<32x128xf32>
    %c0_1 = arith.constant 0 : index
    %c0_2 = arith.constant 0 : index
    %1 = vector.load %arg3[%c0_1, %c0_2] : memref<32x128xf32, #tpu.memory_space<vmem>>, vector<32x128xf32>
    %2 = tpu.iota {dimensions = array<i32: 1>} : vector<1x128xi32>
    %c31_i32 = arith.constant 31 : i32
    %3 = vector.broadcast %c31_i32 : i32 to vector<1x128xi32>
    %4 = arith.andi %2, %3 : vector<1x128xi32>
    %c16_i32 = arith.constant 16 : i32
    %5 = vector.broadcast %c16_i32 : i32 to vector<1x128xi32>
    %6 = arith.cmpi slt, %4, %5 : vector<1x128xi32>
    %c0_3 = arith.constant 0 : index
    %c0_4 = arith.constant 0 : index
    %7 = vector.load %arg4[%c0_3, %c0_4] : memref<32x128xf32, #tpu.memory_space<vmem>>, vector<32x128xf32>
    %c112_i32 = arith.constant 112 : i32
    %8 = tpu.dynamic_rotate %7 by %c112_i32 dim 1 : vector<32x128xf32>, i32 -> vector<32x128xf32>
    %c16_i32_5 = arith.constant 16 : i32
    %9 = tpu.dynamic_rotate %7 by %c16_i32_5 dim 1 : vector<32x128xf32>, i32 -> vector<32x128xf32>
    %10 = vector.shape_cast %6 : vector<1x128xi1> to vector<1x128xi1>
    %11 = vector.broadcast %10 : vector<1x128xi1> to vector<32x128xi1>
    %12 = arith.select %11, %8, %9 : vector<32x128xi1>, vector<32x128xf32>
    %13 = arith.mulf %7, %0 : vector<32x128xf32>
    %14 = arith.mulf %12, %1 : vector<32x128xf32>
    %15 = arith.addf %13, %14 : vector<32x128xf32>
    %c0_6 = arith.constant 0 : index
    %c0_7 = arith.constant 0 : index
    %16 = vector.load %arg6[%c0_6, %c0_7] : memref<32x128xf32, #tpu.memory_space<vmem>>, vector<32x128xf32>
    tpu.vector_store %arg6[%c0_6, %c0_7], %15 {strides = array<i32>} : memref<32x128xf32, #tpu.memory_space<vmem>>, vector<32x128xf32>,
    %c0_8 = arith.constant 0 : index
    %c0_9 = arith.constant 0 : index
    %17 = vector.load %arg5[%c0_8, %c0_9] : memref<32x128xf32, #tpu.memory_space<vmem>>, vector<32x128xf32>
    %c112_i32_10 = arith.constant 112 : i32
    %18 = tpu.dynamic_rotate %17 by %c112_i32_10 dim 1 : vector<32x128xf32>, i32 -> vector<32x128xf32>
    %c16_i32_11 = arith.constant 16 : i32
    %19 = tpu.dynamic_rotate %17 by %c16_i32_11 dim 1 : vector<32x128xf32>, i32 -> vector<32x128xf32>
    %20 = vector.shape_cast %6 : vector<1x128xi1> to vector<1x128xi1>
    %21 = vector.broadcast %20 : vector<1x128xi1> to vector<32x128xi1>
    %22 = arith.select %21, %18, %19 : vector<32x128xi1>, vector<32x128xf32>
    %23 = arith.mulf %17, %0 : vector<32x128xf32>
    %24 = arith.mulf %22, %1 : vector<32x128xf32>
    %25 = arith.addf %23, %24 : vector<32x128xf32>
    %c0_12 = arith.constant 0 : index
    %c0_13 = arith.constant 0 : index
    %26 = vector.load %arg7[%c0_12, %c0_13] : memref<32x128xf32, #tpu.memory_space<vmem>>, vector<32x128xf32>
    tpu.vector_store %arg7[%c0_12, %c0_13], %25 {strides = array<i32>} : memref<32x128xf32, #tpu.memory_space<vmem>>, vector<32x128xf32>,
    return
  }
  func.func @transform_0(%arg0: i32, %arg1: i32) -> (i32, i32) {
    %c0_i32 = arith.constant 0 : i32
    %c0_i32_0 = arith.constant 0 : i32
    return %arg0, %c0_i32 : i32, i32
  }
  func.func @transform_1(%arg0: i32, %arg1: i32) -> (i32, i32) {
    %c0_i32 = arith.constant 0 : i32
    %c0_i32_0 = arith.constant 0 : i32
    return %arg0, %c0_i32 : i32, i32
  }
  func.func @transform_2(%arg0: i32, %arg1: i32) -> (i32, i32) {
    %c1_i32 = arith.constant 1 : i32
    %0 = arith.muli %arg1, %c1_i32 : i32
    %1 = arith.addi %0, %arg0 : i32
    %c0_i32 = arith.constant 0 : i32
    %c0_i32_0 = arith.constant 0 : i32
    return %1, %c0_i32 : i32, i32
  }
  func.func @transform_3(%arg0: i32, %arg1: i32) -> (i32, i32) {
    %c1_i32 = arith.constant 1 : i32
    %0 = arith.muli %arg1, %c1_i32 : i32
    %1 = arith.addi %0, %arg0 : i32
    %c0_i32 = arith.constant 0 : i32
    %c0_i32_0 = arith.constant 0 : i32
    return %1, %c0_i32 : i32, i32
  }
  func.func @transform_4(%arg0: i32, %arg1: i32) -> (i32, i32) {
    %c1_i32 = arith.constant 1 : i32
    %0 = arith.muli %arg1, %c1_i32 : i32
    %1 = arith.addi %0, %arg0 : i32
    %c0_i32 = arith.constant 0 : i32
    %c0_i32_0 = arith.constant 0 : i32
    return %1, %c0_i32 : i32, i32
  }
  func.func @transform_5(%arg0: i32, %arg1: i32) -> (i32, i32) {
    %c1_i32 = arith.constant 1 : i32
    %0 = arith.muli %arg1, %c1_i32 : i32
    %1 = arith.addi %0, %arg0 : i32
    %c0_i32 = arith.constant 0 : i32
    %c0_i32_0 = arith.constant 0 : i32
    return %1, %c0_i32 : i32, i32
  }
}

module attributes {stable_mosaic.version = 11 : i64} {
  func.func @_rope_kernel(%arg0: i32, %arg1: i32, %arg2: memref<32x128xf32, #tpu.memory_space<vmem>>, %arg3: memref<32x128xf32, #tpu.memory_space<vmem>>, %arg4: memref<32x128xf32, #tpu.memory_space<vmem>>, %arg5: memref<32x128xf32, #tpu.memory_space<vmem>>, %arg6: memref<32x128xf32, #tpu.memory_space<vmem>>, %arg7: memref<32x128xf32, #tpu.memory_space<vmem>>) attributes {dimension_semantics = [#tpu.dimension_semantics<parallel>, #tpu.dimension_semantics<parallel>], iteration_bounds = array<i64: 1, 2>, scalar_prefetch = 0 : i64, scratch_operands = 0 : i64, tpu.core_type = #tpu.core_type<tc>, window_params = [{transform_indices = @transform_0, window_bounds = array<i64: 32, 128>}, {transform_indices = @transform_1, window_bounds = array<i64: 32, 128>}, {transform_indices = @transform_2, window_bounds = array<i64: 32, 128>}, {transform_indices = @transform_3, window_bounds = array<i64: 32, 128>}, {transform_indices = @transform_4, window_bounds = array<i64: 32, 128>}, {transform_indices = @transform_5, window_bounds = array<i64: 32, 128>}]} {
    %c0 = arith.constant 0 : index
    %c0_0 = arith.constant 0 : index
    %0 = vector.load %arg2[%c0, %c0_0] : memref<32x128xf32, #tpu.memory_space<vmem>>, vector<32x128xf32>
    %c0_1 = arith.constant 0 : index
    %c0_2 = arith.constant 0 : index
    %1 = vector.load %arg3[%c0_1, %c0_2] : memref<32x128xf32, #tpu.memory_space<vmem>>, vector<32x128xf32>
    %2 = tpu.iota {dimensions = array<i32: 1>} : vector<1x128xi32>
    %c31_i32 = arith.constant 31 : i32
    %3 = vector.broadcast %c31_i32 : i32 to vector<1x128xi32>
    %4 = arith.andi %2, %3 : vector<1x128xi32>
    %c16_i32 = arith.constant 16 : i32
    %5 = vector.broadcast %c16_i32 : i32 to vector<1x128xi32>
    %6 = arith.cmpi slt, %4, %5 : vector<1x128xi32>
    %c0_3 = arith.constant 0 : index
    %c0_4 = arith.constant 0 : index
    %7 = vector.load %arg4[%c0_3, %c0_4] : memref<32x128xf32, #tpu.memory_space<vmem>>, vector<32x128xf32>
    %c112_i32 = arith.constant 112 : i32
    %8 = tpu.dynamic_rotate %7 by %c112_i32 dim 1 : vector<32x128xf32>, i32 -> vector<32x128xf32>
    %c16_i32_5 = arith.constant 16 : i32
    %9 = tpu.dynamic_rotate %7 by %c16_i32_5 dim 1 : vector<32x128xf32>, i32 -> vector<32x128xf32>
    %10 = vector.shape_cast %6 : vector<1x128xi1> to vector<1x128xi1>
    %11 = vector.broadcast %10 : vector<1x128xi1> to vector<32x128xi1>
    %12 = arith.select %11, %8, %9 : vector<32x128xi1>, vector<32x128xf32>
    %13 = arith.mulf %7, %0 : vector<32x128xf32>
    %14 = arith.mulf %12, %1 : vector<32x128xf32>
    %15 = arith.addf %13, %14 : vector<32x128xf32>
    %c0_6 = arith.constant 0 : index
    %c0_7 = arith.constant 0 : index
    %16 = vector.load %arg6[%c0_6, %c0_7] : memref<32x128xf32, #tpu.memory_space<vmem>>, vector<32x128xf32>
    tpu.vector_store %arg6[%c0_6, %c0_7], %15 {strides = array<i32>} : memref<32x128xf32, #tpu.memory_space<vmem>>, vector<32x128xf32>,
    %c0_8 = arith.constant 0 : index
    %c0_9 = arith.constant 0 : index
    %17 = vector.load %arg5[%c0_8, %c0_9] : memref<32x128xf32, #tpu.memory_space<vmem>>, vector<32x128xf32>
    %c112_i32_10 = arith.constant 112 : i32
    %18 = tpu.dynamic_rotate %17 by %c112_i32_10 dim 1 : vector<32x128xf32>, i32 -> vector<32x128xf32>
    %c16_i32_11 = arith.constant 16 : i32
    %19 = tpu.dynamic_rotate %17 by %c16_i32_11 dim 1 : vector<32x128xf32>, i32 -> vector<32x128xf32>
    %20 = vector.shape_cast %6 : vector<1x128xi1> to vector<1x128xi1>
    %21 = vector.broadcast %20 : vector<1x128xi1> to vector<32x128xi1>
    %22 = arith.select %21, %18, %19 : vector<32x128xi1>, vector<32x128xf32>
    %23 = arith.mulf %17, %0 : vector<32x128xf32>
    %24 = arith.mulf %22, %1 : vector<32x128xf32>
    %25 = arith.addf %23, %24 : vector<32x128xf32>
    %c0_12 = arith.constant 0 : index
    %c0_13 = arith.constant 0 : index
    %26 = vector.load %arg7[%c0_12, %c0_13] : memref<32x128xf32, #tpu.memory_space<vmem>>, vector<32x128xf32>
    tpu.vector_store %arg7[%c0_12, %c0_13], %25 {strides = array<i32>} : memref<32x128xf32, #tpu.memory_space<vmem>>, vector<32x128xf32>,
    return
  }
  func.func @transform_0(%arg0: i32, %arg1: i32) -> (i32, i32) {
    %c0_i32 = arith.constant 0 : i32
    %c0_i32_0 = arith.constant 0 : i32
    return %arg0, %c0_i32 : i32, i32
  }
  func.func @transform_1(%arg0: i32, %arg1: i32) -> (i32, i32) {
    %c0_i32 = arith.constant 0 : i32
    %c0_i32_0 = arith.constant 0 : i32
    return %arg0, %c0_i32 : i32, i32
  }
  func.func @transform_2(%arg0: i32, %arg1: i32) -> (i32, i32) {
    %c1_i32 = arith.constant 1 : i32
    %0 = arith.muli %arg1, %c1_i32 : i32
    %1 = arith.addi %0, %arg0 : i32
    %c0_i32 = arith.constant 0 : i32
    %c0_i32_0 = arith.constant 0 : i32
    return %1, %c0_i32 : i32, i32
  }
  func.func @transform_3(%arg0: i32, %arg1: i32) -> (i32, i32) {
    %c1_i32 = arith.constant 1 : i32
    %0 = arith.muli %arg1, %c1_i32 : i32
    %1 = arith.addi %0, %arg0 : i32
    %c0_i32 = arith.constant 0 : i32
    %c0_i32_0 = arith.constant 0 : i32
    return %1, %c0_i32 : i32, i32
  }
  func.func @transform_4(%arg0: i32, %arg1: i32) -> (i32, i32) {
    %c1_i32 = arith.constant 1 : i32
    %0 = arith.muli %arg1, %c1_i32 : i32
    %1 = arith.addi %0, %arg0 : i32
    %c0_i32 = arith.constant 0 : i32
    %c0_i32_0 = arith.constant 0 : i32
    return %1, %c0_i32 : i32, i32
  }
  func.func @transform_5(%arg0: i32, %arg1: i32) -> (i32, i32) {
    %c1_i32 = arith.constant 1 : i32
    %0 = arith.muli %arg1, %c1_i32 : i32
    %1 = arith.addi %0, %arg0 : i32
    %c0_i32 = arith.constant 0 : i32
    %c0_i32_0 = arith.constant 0 : i32
    return %1, %c0_i32 : i32, i32
  }
}

</mosaic_0001>

<bundles_post_ra>
// kernel: tpu_custom_call.1
= control target key start
LH: loop header
LB: loop body
LE: loop exit
PB: predicated region body
PF: predicated region fallthrough
CT: control target
= control target key end

     0   :  { %6 = vsyncpa [#allocation3], 0  ;;  %s128_s0 = inlined_call_operand.hbm [shape: f32[8,128], index: 0, kind: input, shape index: {}]   ;;  %s129_s1 = inlined_call_operand.hbm [shape: f32[8,128], index: 1, kind: output, shape index: {}]  }
   0x1   :  { %7 = vsyncpa [#allocation4], 0  ;;  %s91_s6 = smov [#allocation2]   ;;  %s43_s10 = scalar_lea.hbm %s128_s0, 128 }
   0x2   :  { %s14_s7 = sshll.u32 %s91_s6, 4  ;;  %p44_p0 = scmp.ne.s32.totalorder %s128_s0, %s43_s10  ;;  %s15_s7 = int_to_ptr.vmem [resolvable:$true] %s14_s7 }
   0x3   :  { %p47_p1 = scmp.lt.u32.totalorder %s43_s10, %s128_s0 }
   0x5   :  { %p49_p2 = pnand %p47_p1, %p44_p0 }
   0x7   :  { %52 = shalt.err (!%p49_p2)
}
   0x8   :  { %s53_s15 = scalar_lea.vmem %s15_s7, 128  ;;  %p58_p4 = scmp.lt.s32.totalorder %s15_s7, %s15_s7 }
   0x9   :  { %p54_p3 = scmp.ne.s32.totalorder %s15_s7, %s53_s15  ;;  %p59_p5 = scmp.lt.s32.totalorder %s53_s15, %s53_s15 }
   0xb   :  { %p60_p6 = por %p59_p5, %p58_p4 }
   0xd   :  { %p61_p7 = pnand %p60_p6, %p54_p3 }
   0xf   :  { %64 = shalt.err (!%p61_p7)
}
  0x10   :  { %17 = dma.hbm_to_vmem [thread:$0]  %s128_s0, 128, %s15_s7, [#allocation3]  }
  0x11   :  { %87 = dma.done.wait [#allocation3], 128  }
  0x12   :  { %88 = vsyncadd [#allocation3], 4294967168  ;;  %v21_v0 = vld [vmem:[#allocation2] sm:$0xff]  ;;  %s92_s18 = smov 1   ;;  %s93_s19 = smov [#allocation5]  }
  0x13   :  { %22 = vrot.lane.b32.xlu0 %v21_v0, %s92_s18  ;;  %s31_s20 = sshll.u32 %s93_s19, 4  ;;  %s32_s20 = int_to_ptr.vmem [resolvable:$true] %s31_s20 }
  0x14   :  { %s65_s21 = scalar_lea.vmem %s32_s20, 128  ;;  %p70_p9 = scmp.lt.s32.totalorder %s32_s20, %s32_s20 }
  0x15   :  { %p66_p8 = scmp.ne.s32.totalorder %s32_s20, %s65_s21  ;;  %p71_p10 = scmp.lt.s32.totalorder %s65_s21, %s65_s21 }
  0x17   :  { %p72_p11 = por %p71_p10, %p70_p9 }
  0x19   :  { %p73_p12 = pnand %p72_p11, %p66_p8 }
  0x85   :  { %v23_v1 = vpop.permute.xlu0 %22 }
  0x86   :  { %24 = vst [vmem:[#allocation5] sm:$0xff] %v23_v1 }
  0x87   :  { %76 = shalt.err (!%p73_p12)
}
  0x88   :  { %s77_s0 = scalar_lea.hbm %s129_s1, 128 }
  0x89   :  { %p78_p13 = scmp.ne.s32.totalorder %s129_s1, %s77_s0  ;;  %p81_p0 = scmp.lt.u32.totalorder %s77_s0, %s129_s1 }
  0x8b   :  { %p83_p1 = pnand %p81_p0, %p78_p13 }
  0x8d   :  { %86 = shalt.err (!%p83_p1)
}
  0x8e   :  { %34 = dma.vmem_to_hbm [thread:$0]  %s32_s20, 128, %s129_s1, [#allocation4]  }
  0x8f   :  { %89 = dma.done.wait [#allocation4], 128  }
  0x90   :  { %90 = vsyncadd [#allocation4], 4294967168 }
  0x91   :  { %38 = vsyncpa [#allocation3], 1 }
  0x92   :  { %39 = vsyncpa [#allocation4], 1 }

// kernel: tpu_custom_call.1
= control target key start
LH: loop header
LB: loop body
LE: loop exit
PB: predicated region body
PF: predicated region fallthrough
CT: control target
= control target key end

     0   :  { %s1498_s0 = inlined_call_operand.hbm [shape: f32[32,128], index: 0, kind: input, shape index: {}]   ;;  %s1499_s1 = inlined_call_operand.hbm [shape: f32[32,128], index: 1, kind: input, shape index: {}]   ;;  %s1500_s2 = inlined_call_operand.hbm [shape: f32[64,128], index: 2, kind: input, shape index: {}]   ;;  %s1501_s3 = inlined_call_operand.hbm [shape: f32[64,128], index: 3, kind: input, shape index: {}]   ;;  %s1502_s4 = inlined_call_operand.hbm [shape: f32[64,128], index: 4, kind: output, shape index: {0}]   ;;  %s1503_s5 = inlined_call_operand.hbm [shape: f32[64,128], index: 5, kind: output, shape index: {1}]  }
   0x1   :  { %1518 = sst [smem:[#allocation22_spill]] %s1498_s0 }
   0x2   :  { %1519 = sst [smem:[#allocation23_spill]] %s1500_s2 }
   0x3   :  { %1520 = sst [smem:[#allocation24_spill]] %s1502_s4 }
   0x4   :  { %1521 = sst [smem:[#allocation25_spill]] %s1503_s5 }
   0x5   :  { %11 = vsyncpa [#allocation3], 0 }
   0x6   :  { %12 = vsyncpa [#allocation6], 0 }
   0x7   :  { %13 = vsyncpa [#allocation4], 0 }
   0x8   :  { %15 = vsyncpa [#allocation4 + $0x1], 0 }
   0x9   :  { %16 = vsyncpa [#allocation11], 0 }
   0xa   :  { %18 = vsyncpa [#allocation11 + $0x1], 0  ;;  %s1069_s18 = smov 0   ;;  %s1071_s19 = smov 0  }
   0xb   :  { %s1073_s20 = smov 0   ;;  %s1075_s21 = smov 0  }
   0xc   :  { %s1077_s22 = smov 0   ;;  %s1079_s23 = smov 0  }
   0xd LB: > { %1522 = sst [smem:[#allocation17_spill]] %s1005_s18  ;;  %s1100_s24 = sadd.s32 4294967295, %s1025_s23   ;;  %s1025_s23 = sphi %s1079_s23, %s24_s23   ;;  %s1021_s22 = sphi %s1077_s22, %s1565_s22   ;;  %s1017_s21 = sphi %s1075_s21, %s1564_s21   ;;  %s1013_s20 = sphi %s1073_s20, %s1560_s20   ;;  %s1009_s19 = sphi %s1071_s19, %s1563_s19   ;;  %s1005_s18 = sphi %s1069_s18, %s1562_s18  }
   0xe   : > { %1523 = sst [smem:[#allocation18_spill]] %s1013_s20  ;;  %s658_s25 = sadd.s32 4294967294, %s1025_s23  }
   0xf   : > { %p104_p0 = scmp.ne.s32.totalorder %s1013_s20, %s1009_s19  ;;  %p105_p1 = scmp.eq.s32.totalorder %s1025_s23, 0 }
  0x10   : > { %p110_p2 = scmp.ne.s32.totalorder %s1009_s19, %s1005_s18  ;;  %p1504_p3 = scmp.eq.s32.totalorder %s1100_s24, 0 }
  0x11   : > { %p164_p4 = scmp.eq.s32.totalorder %s1100_s24, 1  ;;  %p1111_p5 = por %p105_p1, %p104_p0 }
  0x12   : > { %p170_p6 = scmp.eq.s32.totalorder %s658_s25, 1  ;;  %p1117_p7 = por %p1504_p3, %p110_p2 }
  0x13   : > { %p1121_p8 = por %p164_p4, %p104_p0  ;;  %p659_p10 = scmp.ge.s32.totalorder %s1025_s23, 1 }
  0x14   : > { %s1525_s28 = scalar_select %p1117_p7, 1, 0 }
  0x15   : > { %s1526_s29 = scalar_select %p1121_p8, 1, 0 }
  0x16   : > { %p1125_p9 = por %p170_p6, %p110_p2  ;;  %p205_p11 = scmp.lt.s32.totalorder %s1025_s23, 3 }
  0x17   : > { %s1027_s7 = smov [#allocation2]   ;;  %p727_p1 = scmp.lt.s32.totalorder %s1025_s23, 2 }
  0x18   : > { %s1527_s30 = scalar_select %p1125_p9, 1, 0 }
  0x19   : > { %p1131_p12 = pnand %p659_p10, %p205_p11  ;;  %s220_s8 = sshll.u32 %s1027_s7, 4  ;;  %s1135_s8 = int_to_ptr.vmem [resolvable:$true] %s220_s8 }
  0x1a   : > { %1528 = sst [smem:[#allocation19_spill]] %s1527_s30  ;;  %p1149_p4 = pnand %p727_p1, %p1111_p5 }
  0x1b   : > { %s1529_s6 = scalar_select %p1131_p12, 1, 0 }
  0x1c   : > { %p704_p13 = pneg %p1131_p12  ;;  %s33_s11 = sadd.s32 1, %s1021_s22 }
  0x1d   : > { %s1531_s10 = scalar_select %p1149_p4, 1, 0 }
  0x1e   : > { %p1143_p2 = pnand %p704_p13, %p1504_p3  ;;  %p1154_p6 = scmp.ge.s32.totalorder %s33_s11, 2 }
  0x1f   : > { %s1533_s0 = sld [smem:[#allocation22_spill]] }
  0x20   : > { %p1512_p11 = pneg %p1143_p2 }
  0x25   : > { %s787_s15 = scalar_lea.hbm %s1533_s0, 512 }
  0x26   : > { %p788_p10 = scmp.ne.s32.totalorder %s1533_s0, %s787_s15  ;;  %p794_p1 = scmp.lt.u32.totalorder %s787_s15, %s1533_s0 }
  0x28   : > { %p790_p5 = pnand %p1512_p11, %p788_p10 }
  0x2a   : > { %p791_p13 = pneg %p790_p5 }
  0x2c   : > { %p796_p0 = pnand %p794_p1, %p791_p13 }
  0x2e   : > { %799 = shalt.err (!%p796_p0)
}
  0x2f   : > { %s800_s7 = scalar_lea.vmem %s1135_s8, 512  ;;  %p808_p7 = scmp.lt.s32.totalorder %s1135_s8, %s1135_s8 }
  0x30   : > { %p801_p3 = scmp.ne.s32.totalorder %s1135_s8, %s800_s7  ;;  %p809_p10 = scmp.lt.s32.totalorder %s800_s7, %s800_s7 }
  0x32   : > { %p803_p9 = pnand %p801_p3, %p1512_p11  ;;  %p810_p5 = por %p809_p10, %p808_p7 }
  0x34   : > { %p804_p8 = pneg %p803_p9 }
  0x36   : > { %p811_p12 = pnand %p810_p5, %p804_p8 }
  0x38   : > { %814 = shalt.err (!%p811_p12)
}
  0x39   : > { %s1028_s13 = smov 128   ;;  %s1029_s14 = smov 8  }
  0x3a   : > { %707 = dma.hbm_to_vmem [thread:$0]  (!%p1143_p2), %s1533_s0, 512, %s1135_s8, [#allocation3], %s1028_s13, %s1028_s13, %s1029_s14  }
  0x3b   : > { %s250_s17 = sand.u32 1, %s1025_s23   ;;  %s1567_s11 = smov (%p1154_p6, %s33_s11), 0 }
  0x3c   : > { %1534 = sst [smem:[#allocation20_spill]] %s1567_s11  ;;  %s252_s25 = sand.u32 1, %s1013_s20  }
  0x3d   : > { %s94_s27 = ssub.s32 %s1021_s22, %s1567_s11  ;;  %s1196_s7 = sshll.u32 %s252_s25, 5 }
  0x3e   : > { %p95_p3 = scmp.eq.s32.totalorder %s94_s27, 0  ;;  %s684_s26 = sshll.u32 %s1021_s22, 9 }
  0x3f   : > { %s254_s30 = scalar_lea.vmem [#allocation7], %s1196_s7  ;;  %s1535_s5 = sadd.s32 1, %s1013_s20 }
  0x40   : > { %s262_s18 = sshll.u32 %s254_s30, 4  ;;  %s1537_s2 = sld [smem:[#allocation23_spill]]  ;;  %s1212_s18 = int_to_ptr.vmem [resolvable:$true] %s262_s18 }
  0x41   : > { %s1203_s4 = scalar_select %p95_p3, %s1013_s20, %s1535_s5  }
  0x42   : > { %s1214_s16 = scalar_lea.sflag [#allocation3], %s250_s17  ;;  %p1515_p8 = pneg %p1149_p4 }
  0x43   : > { %1536 = sst [smem:[#allocation21_spill]] %s1203_s4 }
  0x46   : > { %s1210_s12 = scalar_lea.hbm %s1537_s2, %s684_s26  ;;  %s820_s27 = scalar_lea.hbm %s1537_s2, 1024 }
  0x47   : > { %s815_s25 = scalar_lea.hbm %s1210_s12, 512  ;;  %p821_p0 = scmp.lt.u32.totalorder %s1210_s12, %s1537_s2 }
  0x48   : > { %p816_p7 = scmp.ne.s32.totalorder %s1210_s12, %s815_s25  ;;  %p822_p6 = scmp.lt.u32.totalorder %s820_s27, %s815_s25 }
  0x49   : > { %p824_p1 = scmp.lt.u32.totalorder %s815_s25, %s1210_s12 }
  0x4a   : > { %p818_p9 = pnand %p1515_p8, %p816_p7  ;;  %p823_p13 = por %p822_p6, %p821_p0 }
  0x4c   : > { %p819_p12 = pneg %p818_p9  ;;  %p825_p10 = por %p824_p1, %p823_p13 }
  0x4e   : > { %p826_p5 = pnand %p825_p10, %p819_p12 }
  0x50   : > { %829 = shalt.err (!%p826_p5)
}
  0x51   : > { %s830_s17 = scalar_lea.vmem %s1212_s18, 512  ;;  %s1030_s5 = smov [#allocation7]  }
  0x52   : > { %p831_p3 = scmp.ne.s32.totalorder %s1212_s18, %s830_s17  ;;  %s835_s30 = sshll.u32 %s1030_s5, 4  ;;  %s836_s30 = int_to_ptr.vmem [resolvable:$false] %s835_s30 }
  0x53   : > { %s837_s8 = scalar_lea.vmem %s836_s30, 1024  ;;  %p838_p11 = scmp.lt.s32.totalorder %s1212_s18, %s836_s30 }
  0x54   : > { %p833_p7 = pnand %p831_p3, %p1515_p8  ;;  %p839_p0 = scmp.lt.s32.totalorder %s837_s8, %s830_s17 }
  0x56   : > { %p834_p9 = pneg %p833_p7  ;;  %p840_p6 = por %p839_p0, %p838_p11 }
  0x58   : > { %p841_p13 = pnand %p840_p6, %p834_p9 }
  0x5a   : > { %844 = shalt.err (!%p841_p13)
}
  0x5b   : > { %714 = dma.hbm_to_vmem [thread:$0]  (!%p1149_p4), %s1210_s12, 512, %s1212_s18, %s1214_s16, %s1028_s13, %s1028_s13, %s1029_s14  }
  0x5c   : > { %s1031_s25 = smov [#allocation5]   ;;  %s1250_s5 = scalar_lea.hbm %s1501_s3, %s684_s26 }
  0x5d   : > { %s236_s27 = sshll.u32 %s1031_s25, 4  ;;  %s276_s30 = scalar_lea.vmem [#allocation8], %s1196_s7  ;;  %s237_s27 = int_to_ptr.vmem [resolvable:$true] %s236_s27 }
  0x5e   : > { %s284_s8 = sshll.u32 %s276_s30, 4  ;;  %s845_s11 = scalar_lea.hbm %s1499_s1, 512  ;;  %s1276_s8 = int_to_ptr.vmem [resolvable:$true] %s284_s8 }
  0x5f   : > { %p846_p11 = scmp.ne.s32.totalorder %s1499_s1, %s845_s11  ;;  %p1538_p12 = pneg %p1143_p2 }
  0x60   : > { %p852_p5 = scmp.lt.u32.totalorder %s845_s11, %s1499_s1 }
  0x61   : > { %p848_p1 = pnand %p846_p11, %p1538_p12 }
  0x63   : > { %p849_p10 = pneg %p848_p1 }
  0x65   : > { %p854_p3 = pnand %p852_p5, %p849_p10 }
  0x67   : > { %857 = shalt.err (!%p854_p3)
}
  0x68   : > { %s858_s26 = scalar_lea.vmem %s237_s27, 512  ;;  %p1539_p9 = pmov %p1538_p12 }
  0x69   : > { %p859_p7 = scmp.ne.s32.totalorder %s237_s27, %s858_s26  ;;  %p866_p13 = scmp.lt.s32.totalorder %s237_s27, %s237_s27 }
  0x6a   : > { %p867_p8 = scmp.lt.s32.totalorder %s858_s26, %s858_s26 }
  0x6b   : > { %p861_p0 = pnand %p859_p7, %p1539_p9 }
  0x6c   : > { %p868_p4 = por %p867_p8, %p866_p13 }
  0x6d   : > { %p862_p6 = pneg %p861_p0 }
  0x6f   : > { %p869_p11 = pnand %p868_p4, %p862_p6 }
  0x71   : > { %872 = shalt.err (!%p869_p11)
}
  0x72   : > { %710 = dma.hbm_to_vmem [thread:$0]  (!%p1143_p2), %s1499_s1, 512, %s237_s27, [#allocation6], %s1028_s13, %s1028_s13, %s1029_s14  }
  0x73   : > { %s873_s4 = scalar_lea.hbm %s1250_s5, 512  ;;  %p1540_p4 = scmp.ne.s32.totalorder %s1531_s10, 0 }
  0x74   : > { %p874_p8 = scmp.ne.s32.totalorder %s1250_s5, %s873_s4  ;;  %s878_s11 = scalar_lea.hbm %s1501_s3, 1024 }
  0x75   : > { %p1541_p12 = pneg %p1540_p4  ;;  %p879_p5 = scmp.lt.u32.totalorder %s1250_s5, %s1501_s3 }
  0x76   : > { %p880_p3 = scmp.lt.u32.totalorder %s878_s11, %s873_s4  ;;  %p882_p9 = scmp.lt.u32.totalorder %s873_s4, %s1250_s5 }
  0x77   : > { %p876_p1 = pnand %p874_p8, %p1541_p12 }
  0x78   : > { %p881_p7 = por %p880_p3, %p879_p5 }
  0x79   : > { %p877_p10 = pneg %p876_p1 }
  0x7a   : > { %p883_p2 = por %p882_p9, %p881_p7 }
  0x7c   : > { %p884_p0 = pnand %p883_p2, %p877_p10 }
  0x7e   : > { %887 = shalt.err (!%p884_p0)
}
  0x7f   : > { %s888_s27 = scalar_lea.vmem %s1276_s8, 512  ;;  %p1542_p13 = pmov %p1541_p12 }
  0x80   : > { %p889_p6 = scmp.ne.s32.totalorder %s1276_s8, %s888_s27  ;;  %s1032_s15 = smov [#allocation8]  }
  0x81   : > { %s893_s17 = sshll.u32 %s1032_s15, 4  ;;  %s894_s17 = int_to_ptr.vmem [resolvable:$false] %s893_s17 }
  0x82   : > { %p891_p11 = pnand %p889_p6, %p1542_p13  ;;  %s895_s30 = scalar_lea.vmem %s894_s17, 1024 }
  0x83   : > { %p896_p12 = scmp.lt.s32.totalorder %s1276_s8, %s894_s17  ;;  %p897_p1 = scmp.lt.s32.totalorder %s895_s30, %s888_s27 }
  0x84   : > { %p892_p8 = pneg %p891_p11 }
  0x85   : > { %p898_p5 = por %p897_p1, %p896_p12 }
  0x87   : > { %p899_p3 = pnand %p898_p5, %p892_p8 }
  0x89   : > { %902 = shalt.err (!%p899_p3)
}
  0x8a   : > { %717 = dma.hbm_to_vmem [thread:$0]  (!%p1540_p4), %s1250_s5, 512, %s1276_s8, %s1214_s16, %s1028_s13, %s1028_s13, %s1029_s14  }
  0x8b   : > { %p1543_p10 = scmp.ne.s32.totalorder %s1529_s6, 0 }
  0x8c   : > { %p1544_p7 = scmp.eq.s32.totalorder (!%p1543_p10), %s1100_s24, 0 }
  0x8d   : > { %296 = sbr.rel (%p1543_p10) target bundleno = 331 (0x14b), region = 36 }
  0x94   : > { %984 = dma.done.wait (%p1544_p7), [#allocation3], 512   ;;  %p1545_p9 = pmov %p1544_p7 }
  0x95   : > { %p1546_p2 = pmov %p1544_p7 }
  0x96   : > { %986 = vsyncadd (%p1545_p9), [#allocation3], 4294966784 }
  0x97   : > { %988 = dma.done.wait (%p1546_p2), [#allocation6], 512   ;;  %p1547_p0 = pmov %p1546_p2 }
  0x98   : > { %s306_s10 = sand.u32 1, %s1100_s24   ;;  %s1317_s13 = sand.u32 1, %s1009_s19  }
  0x99   : > { %990 = vsyncadd (%p1547_p0), [#allocation6], 4294966784  ;;  %s1320_s6 = sshll.u32 %s1317_s13, 5  ;;  %s307_s14 = scalar_lea.sflag [#allocation3], %s306_s10 }
  0x9a   : > { %s310_s16 = scalar_lea.vmem [#allocation7], %s1320_s6  ;;  %p1548_p4 = scmp.ne.s32.totalorder %s1525_s28, 0 }
  0x9c   : > { %992 = dma.done.wait (%p1548_p4), %s307_s14, 1024  }
  0x9d   : > { %994 = vsyncadd (%p1548_p4), %s307_s14, 4294966272  ;;  %v380_v0 = vld [vmem:[%s310_s16 + $0x10] sm:$0xff]  ;;  %v378_v1 = vld [vmem:[%s310_s16] sm:$0xff]  ;;  %s1033_s5 = smov 112   ;;  %s1034_s24 = smov 16   ;;  %v374_v8 = vlaneseq }
  0x9e   : > { %386 = vrot.lane.b32.xlu1 %v380_v0, %s1033_s5  ;;  %382 = vrot.lane.b32.xlu0 %v378_v1, %s1033_s5  ;;  %v381_v2 = vld [vmem:[%s310_s16 + $0x18] sm:$0xff]  ;;  %v379_v3 = vld [vmem:[%s310_s16 + $0x8] sm:$0xff]  ;;  %s319_s8 = scalar_lea.vmem [#allocation8], %s1320_s6  ;;  %v1344_v15 = vld [vmem:[#allocation2] sm:$0xff]  ;;  %s348_s28 = scalar_lea.vmem [#allocation9], %s1320_s6 }
  0x9f   : > { %v1328_v4 = vld [vmem:[%s319_s8 + $0x8] sm:$0xff]  ;;  %v1330_v5 = vld [vmem:[%s319_s8] sm:$0xff]  ;;  %v1334_v6 = vld [vmem:[%s319_s8 + $0x18] sm:$0xff]  ;;  %v375_v9 = vand.u32 127, %v374_v8  ;;  %v404_v20 = vmul.f32 %v378_v1, %v1344_v15  ;;  %s480_s18 = sshll.u32 %s348_s28, 4  ;;  %s686_s12 = sshll.u32 %s1017_s21, 9  ;;  %s1380_s18 = int_to_ptr.vmem [resolvable:$true] %s480_s18 }
  0xa0   : > { %v1336_v7 = vld [vmem:[%s319_s8 + $0x10] sm:$0xff]  ;;  %v1346_v16 = vld [vmem:[#allocation2 + $0x8] sm:$0xff]  ;;  %v1354_v19 = vld [vmem:[#allocation5] sm:$0xff]  ;;  %s1551_s2 = sld [smem:[#allocation24_spill]]  ;;  %s461_s20 = scalar_lea.sflag [#allocation4], %s1317_s13 }
  0xa1   : > { %v376_v12 = vand.u32 31, %v375_v9  ;;  %v1352_v18 = vld [vmem:[#allocation5 + $0x8] sm:$0xff]  ;;  %v405_v21 = vmul.f32 %v379_v3, %v1346_v16  ;;  %v1358_v24 = vld [vmem:[#allocation2 + $0x10] sm:$0xff]  ;;  %v1360_v25 = vld [vmem:[#allocation2 + $0x18] sm:$0xff]  ;;  %s903_s9 = scalar_lea.vmem %s1380_s18, 512  ;;  %p1552_p13 = scmp.ne.s32.totalorder %s1526_s29, 0 }
  0xa2   : > { %388 = vrot.lane.b32.xlu1 %v381_v2, %s1033_s5  ;;  %384 = vrot.lane.b32.xlu0 %v379_v3, %s1033_s5  ;;  %v1369_v30 = vld [vmem:[#allocation5 + $0x18] sm:$0xff]  ;;  %v1371_v31 = vld [vmem:[#allocation5 + $0x10] sm:$0xff]  ;;  %v406_v32 = vmul.f32 %v380_v0, %v1358_v24  ;;  %v407_v33 = vmul.f32 %v381_v2, %v1360_v25  ;;  %p904_p6 = scmp.ne.s32.totalorder %s1380_s18, %s903_s9  ;;  %s1035_s11 = smov [#allocation9]  }
  0xa3   : > { %vm1348_vm0 = vcmp.lt.s32.totalorder %v376_v12, 16  ;;  %s907_s7 = sshll.u32 %s1035_s11, 4  ;;  %s908_s7 = int_to_ptr.vmem [resolvable:$false] %s907_s7 }
  0xa4   : > { %p905_p11 = pnand %p904_p6, %p1552_p13  ;;  %s909_s25 = scalar_lea.vmem %s908_s7, 1024 }
  0xa5   : > { %p910_p12 = scmp.lt.s32.totalorder %s1380_s18, %s908_s7  ;;  %p911_p1 = scmp.lt.s32.totalorder %s909_s25, %s903_s9 }
  0xa6   : > { %392 = vrot.lane.b32.xlu1 %v379_v3, %s1034_s24  ;;  %390 = vrot.lane.b32.xlu0 %v378_v1, %s1034_s24  ;;  %s1389_s4 = scalar_lea.hbm %s1551_s2, %s686_s12  ;;  %p906_p8 = pneg %p905_p11 }
  0xa7   : > { %p912_p5 = por %p911_p1, %p910_p12 }
  0xa9   : > { %p913_p3 = pnand %p912_p5, %p906_p8 }
  0xaa   : > { %396 = vrot.lane.b32.xlu1 %v381_v2, %s1034_s24  ;;  %394 = vrot.lane.b32.xlu0 %v380_v0, %s1034_s24 }
  0xae   : > { %426 = vrot.lane.b32.xlu1 %v1328_v4, %s1033_s5  ;;  %424 = vrot.lane.b32.xlu0 %v1330_v5, %s1033_s5 }
  0xb2   : > { %430 = vrot.lane.b32.xlu1 %v1334_v6, %s1033_s5  ;;  %428 = vrot.lane.b32.xlu0 %v1336_v7, %s1033_s5 }
  0xb6   : > { %434 = vrot.lane.b32.xlu1 %v1328_v4, %s1034_s24  ;;  %432 = vrot.lane.b32.xlu0 %v1330_v5, %s1034_s24 }
  0xba   : > { %438 = vrot.lane.b32.xlu1 %v1334_v6, %s1034_s24  ;;  %436 = vrot.lane.b32.xlu0 %v1336_v7, %s1034_s24 }
 0x110   : > { %v387_v10 = vpop.permute.xlu1 %386  ;;  %v383_v11 = vpop.permute.xlu0 %382 }
 0x114   : > { %v389_v13 = vpop.permute.xlu1 %388  ;;  %v385_v14 = vpop.permute.xlu0 %384 }
 0x118   : > { %v393_v22 = vpop.permute.xlu1 %392  ;;  %v391_v23 = vpop.permute.xlu0 %390 }
 0x119   : > { %v401_v26 = vsel %vm1348_vm0, %v385_v14, %v393_v22  ;;  %v400_v27 = vsel %vm1348_vm0, %v383_v11, %v391_v23 }
 0x11a   : > { %v409_v28 = vmul.f32 %v401_v26, %v1352_v18  ;;  %v408_v29 = vmul.f32 %v400_v27, %v1354_v19 }
 0x11c   : > { %v413_v34 = vadd.f32 %v409_v28, %v405_v21  ;;  %v412_v35 = vadd.f32 %v408_v29, %v404_v20  ;;  %v397_v36 = vpop.permute.xlu1 %396  ;;  %v395_v37 = vpop.permute.xlu0 %394 }
 0x11d   : > { %v403_v38 = vsel %vm1348_vm0, %v389_v13, %v397_v36  ;;  %v402_v39 = vsel %vm1348_vm0, %v387_v10, %v395_v37 }
 0x11e   : > { %417 = vst [vmem:[%s348_s28 + $0x8] sm:$0xff] %v413_v34  ;;  %416 = vst [vmem:[%s348_s28] sm:$0xff] %v412_v35  ;;  %v411_v40 = vmul.f32 %v403_v38, %v1369_v30  ;;  %v410_v41 = vmul.f32 %v402_v39, %v1371_v31 }
 0x120   : > { %v415_v42 = vadd.f32 %v411_v40, %v407_v33  ;;  %v414_v43 = vadd.f32 %v410_v41, %v406_v32  ;;  %v427_v44 = vpop.permute.xlu1 %426  ;;  %v425_v45 = vpop.permute.xlu0 %424 }
 0x122   : > { %419 = vst [vmem:[%s348_s28 + $0x18] sm:$0xff] %v415_v42  ;;  %418 = vst [vmem:[%s348_s28 + $0x10] sm:$0xff] %v414_v43 }
 0x123   : > { %916 = shalt.err (!%p913_p3)
}
 0x124   : > { %s917_s27 = scalar_lea.hbm %s1389_s4, 512  ;;  %s921_s30 = scalar_lea.hbm %s1551_s2, 1024 }
 0x125   : > { %p918_p10 = scmp.ne.s32.totalorder %s1389_s4, %s917_s27  ;;  %p922_p2 = scmp.lt.u32.totalorder %s1389_s4, %s1551_s2 }
 0x126   : > { %p923_p0 = scmp.lt.u32.totalorder %s921_s30, %s917_s27  ;;  %p925_p6 = scmp.lt.u32.totalorder %s917_s27, %s1389_s4 }
 0x127   : > { %p919_p7 = pnand %p918_p10, %p1552_p13 }
 0x128   : > { %p924_p4 = por %p923_p0, %p922_p2 }
 0x129   : > { %p920_p9 = pneg %p919_p7 }
 0x12a   : > { %p926_p11 = por %p925_p6, %p924_p4 }
 0x12c   : > { %p927_p8 = pnand %p926_p11, %p920_p9 }
 0x12e   : > { %930 = shalt.err (!%p927_p8)
}
 0x12f   : > { %s1036_s16 = smov 128   ;;  %s1037_s5 = smov 8   ;;  %v431_v46 = vpop.permute.xlu1 %430  ;;  %v429_v47 = vpop.permute.xlu0 %428  ;;  %v445_v48 = vmul.f32 %v1328_v4, %v1346_v16  ;;  %v444_v49 = vmul.f32 %v1330_v5, %v1344_v15  ;;  %v447_v56 = vmul.f32 %v1334_v6, %v1360_v25  ;;  %v446_v57 = vmul.f32 %v1336_v7, %v1358_v24 }
 0x130   : > { %700 = dma.vmem_to_hbm [thread:$0]  (%p1552_p13), %s1380_s18, 512, %s1389_s4, %s461_s20, %s1036_s16, %s1036_s16, %s1037_s5  }
 0x131   : > { %s355_s24 = scalar_lea.vmem [#allocation10], %s1320_s6  ;;  %s1553_s18 = sld [smem:[#allocation25_spill]] }
 0x132   : > { %s497_s8 = sshll.u32 %s355_s24, 4  ;;  %s466_s4 = scalar_lea.sflag [#allocation11], %s1317_s13  ;;  %s1439_s8 = int_to_ptr.vmem [resolvable:$true] %s497_s8 }
 0x133   : > { %v435_v50 = vpop.permute.xlu1 %434  ;;  %v433_v51 = vpop.permute.xlu0 %432  ;;  %s931_s20 = scalar_lea.vmem %s1439_s8, 512  ;;  %s1038_s9 = smov [#allocation10]  }
 0x134   : > { %v441_v52 = vsel %vm1348_vm0, %v427_v44, %v435_v50  ;;  %v440_v53 = vsel %vm1348_vm0, %v425_v45, %v433_v51  ;;  %p932_p12 = scmp.ne.s32.totalorder %s1439_s8, %s931_s20  ;;  %s935_s11 = sshll.u32 %s1038_s9, 4  ;;  %s936_s11 = int_to_ptr.vmem [resolvable:$false] %s935_s11 }
 0x135   : > { %v449_v54 = vmul.f32 %v441_v52, %v1352_v18  ;;  %v448_v55 = vmul.f32 %v440_v53, %v1354_v19  ;;  %s937_s7 = scalar_lea.vmem %s936_s11, 1024  ;;  %p938_p3 = scmp.lt.s32.totalorder %s1439_s8, %s936_s11 }
 0x136   : > { %p933_p1 = pnand %p932_p12, %p1552_p13  ;;  %p939_p10 = scmp.lt.s32.totalorder %s937_s7, %s931_s20 }
 0x137   : > { %v453_v58 = vadd.f32 %v449_v54, %v445_v48  ;;  %v452_v59 = vadd.f32 %v448_v55, %v444_v49  ;;  %v439_v60 = vpop.permute.xlu1 %438  ;;  %v437_v61 = vpop.permute.xlu0 %436  ;;  %s1554_s26 = smov %s1553_s18  ;;  %s1446_s0 = scalar_lea.hbm %s1553_s18, %s686_s12 }
 0x138   : > { %v443_v62 = vsel %vm1348_vm0, %v431_v46, %v439_v60  ;;  %v442_v63 = vsel %vm1348_vm0, %v429_v47, %v437_v61  ;;  %p934_p5 = pneg %p933_p1  ;;  %p940_p7 = por %p939_p10, %p938_p3 }
 0x139   : > { %457 = vst [vmem:[%s355_s24 + $0x8] sm:$0xff] %v453_v58  ;;  %456 = vst [vmem:[%s355_s24] sm:$0xff] %v452_v59  ;;  %v451_v0 = vmul.f32 %v443_v62, %v1369_v30  ;;  %v450_v1 = vmul.f32 %v442_v63, %v1371_v31 }
 0x13a   : > { %p941_p9 = pnand %p940_p7, %p934_p5 }
 0x13b   : > { %v455_v2 = vadd.f32 %v451_v0, %v447_v56  ;;  %v454_v3 = vadd.f32 %v450_v1, %v446_v57 }
 0x13d   : > { %459 = vst [vmem:[%s355_s24 + $0x18] sm:$0xff] %v455_v2  ;;  %458 = vst [vmem:[%s355_s24 + $0x10] sm:$0xff] %v454_v3 }
 0x13e   : > { %944 = shalt.err (!%p941_p9)
}
 0x13f   : > { %s945_s21 = scalar_lea.hbm %s1446_s0, 512  ;;  %s949_s27 = scalar_lea.hbm %s1554_s26, 1024 }
 0x140   : > { %p946_p2 = scmp.ne.s32.totalorder %s1446_s0, %s945_s21  ;;  %p950_p6 = scmp.lt.u32.totalorder %s1446_s0, %s1554_s26 }
 0x141   : > { %p951_p11 = scmp.lt.u32.totalorder %s949_s27, %s945_s21  ;;  %p953_p12 = scmp.lt.u32.totalorder %s945_s21, %s1446_s0 }
 0x142   : > { %p947_p0 = pnand %p946_p2, %p1552_p13 }
 0x143   : > { %p952_p8 = por %p951_p11, %p950_p6 }
 0x144   : > { %p948_p4 = pneg %p947_p0 }
 0x145   : > { %p954_p1 = por %p953_p12, %p952_p8 }
 0x147   : > { %p955_p5 = pnand %p954_p1, %p948_p4 }
 0x149   : > { %958 = shalt.err (!%p955_p5)
}
 0x14a   : > { %701 = dma.vmem_to_hbm [thread:$0]  (%p1552_p13), %s1439_s8, 512, %s1446_s0, %s466_s4, %s1036_s16, %s1036_s16, %s1037_s5  }
 0x14b PF: > { %s1555_s30 = sld [smem:[#allocation17_spill]]  ;;  %s1556_s10 = sld [smem:[#allocation19_spill]] }
 0x14c   : > { %p1558_p10 = scmp.ge.s32.totalorder %s1025_s23, 2 }
 0x151   : > { %s512_s14 = sand.u32 1, %s1555_s30   ;;  %p1557_p3 = scmp.ne.s32.totalorder %s1556_s10, 0 }
 0x152   : > { %s513_s24 = scalar_lea.sflag [#allocation4], %s512_s14 }
 0x153   : > { %p719_p7 = pnand %p1558_p10, %p1557_p3 }
 0x155   : > { %996 = dma.done.wait (!%p719_p7), %s513_s24, 512  }
 0x156   : > { %998 = vsyncadd (!%p719_p7), %s513_s24, 4294966784  ;;  %s522_s29 = scalar_lea.sflag [#allocation11], %s512_s14 }
 0x157   : > { %1000 = dma.done.wait (!%p719_p7), %s522_s29, 512  }
 0x158   : > { %1002 = vsyncadd (!%p719_p7), %s522_s29, 4294966784  ;;  %s24_s23 = sadd.s32 1, %s1025_s23   ;;  %s1559_s13 = sld [smem:[#allocation18_spill]] }
 0x159   : > { %p21_p9 = scmp.ge.s32.totalorder %s24_s23, 4   ;;  %s1560_s20 = sld [smem:[#allocation21_spill]] }
 0x15a   : > { %s1561_s16 = sld [smem:[#allocation20_spill]]  ;;  %s1562_s18 = smov %s1009_s19 }
 0x15b   : > { %s1564_s21 = smov %s1021_s22  ;;  %23 = sbr.rel (!%p21_p9) target bundleno = 13 (0xd), region = 118 }
 0x15e   : > { %s1563_s19 = smov %s1559_s13 }
 0x160   : > { %s1565_s22 = smov %s1561_s16 }
 0x162   :  { %527 = vsyncpa [#allocation3], 1 }
 0x163   :  { %529 = vsyncpa [#allocation3 + $0x1], 1 }
 0x164   :  { %530 = vsyncpa [#allocation6], 1 }
 0x165   :  { %531 = vsyncpa [#allocation4], 1 }
 0x166   :  { %533 = vsyncpa [#allocation4 + $0x1], 1 }
 0x167   :  { %534 = vsyncpa [#allocation11], 1 }
 0x168   :  { %536 = vsyncpa [#allocation11 + $0x1], 1 }

// kernel: tpu_custom_call.1
= control target key start
LH: loop header
LB: loop body
LE: loop exit
PB: predicated region body
PF: predicated region fallthrough
CT: control target
= control target key end

     0   :  { %s1498_s0 = inlined_call_operand.hbm [shape: f32[32,128], index: 0, kind: input, shape index: {}]   ;;  %s1499_s1 = inlined_call_operand.hbm [shape: f32[32,128], index: 1, kind: input, shape index: {}]   ;;  %s1500_s2 = inlined_call_operand.hbm [shape: f32[64,128], index: 2, kind: input, shape index: {}]   ;;  %s1501_s3 = inlined_call_operand.hbm [shape: f32[64,128], index: 3, kind: input, shape index: {}]   ;;  %s1502_s4 = inlined_call_operand.hbm [shape: f32[64,128], index: 4, kind: output, shape index: {0}]   ;;  %s1503_s5 = inlined_call_operand.hbm [shape: f32[64,128], index: 5, kind: output, shape index: {1}]  }
   0x1   :  { %1518 = sst [smem:[#allocation22_spill]] %s1498_s0 }
   0x2   :  { %1519 = sst [smem:[#allocation23_spill]] %s1500_s2 }
   0x3   :  { %1520 = sst [smem:[#allocation24_spill]] %s1502_s4 }
   0x4   :  { %1521 = sst [smem:[#allocation25_spill]] %s1503_s5 }
   0x5   :  { %11 = vsyncpa [#allocation3], 0 }
   0x6   :  { %12 = vsyncpa [#allocation6], 0 }
   0x7   :  { %13 = vsyncpa [#allocation4], 0 }
   0x8   :  { %15 = vsyncpa [#allocation4 + $0x1], 0 }
   0x9   :  { %16 = vsyncpa [#allocation11], 0 }
   0xa   :  { %18 = vsyncpa [#allocation11 + $0x1], 0  ;;  %s1069_s18 = smov 0   ;;  %s1071_s19 = smov 0  }
   0xb   :  { %s1073_s20 = smov 0   ;;  %s1075_s21 = smov 0  }
   0xc   :  { %s1077_s22 = smov 0   ;;  %s1079_s23 = smov 0  }
   0xd LB: > { %1522 = sst [smem:[#allocation17_spill]] %s1005_s18  ;;  %s1100_s24 = sadd.s32 4294967295, %s1025_s23   ;;  %s1025_s23 = sphi %s1079_s23, %s24_s23   ;;  %s1021_s22 = sphi %s1077_s22, %s1565_s22   ;;  %s1017_s21 = sphi %s1075_s21, %s1564_s21   ;;  %s1013_s20 = sphi %s1073_s20, %s1560_s20   ;;  %s1009_s19 = sphi %s1071_s19, %s1563_s19   ;;  %s1005_s18 = sphi %s1069_s18, %s1562_s18  }
   0xe   : > { %1523 = sst [smem:[#allocation18_spill]] %s1013_s20  ;;  %s658_s25 = sadd.s32 4294967294, %s1025_s23  }
   0xf   : > { %p104_p0 = scmp.ne.s32.totalorder %s1013_s20, %s1009_s19  ;;  %p105_p1 = scmp.eq.s32.totalorder %s1025_s23, 0 }
  0x10   : > { %p110_p2 = scmp.ne.s32.totalorder %s1009_s19, %s1005_s18  ;;  %p1504_p3 = scmp.eq.s32.totalorder %s1100_s24, 0 }
  0x11   : > { %p164_p4 = scmp.eq.s32.totalorder %s1100_s24, 1  ;;  %p1111_p5 = por %p105_p1, %p104_p0 }
  0x12   : > { %p170_p6 = scmp.eq.s32.totalorder %s658_s25, 1  ;;  %p1117_p7 = por %p1504_p3, %p110_p2 }
  0x13   : > { %p1121_p8 = por %p164_p4, %p104_p0  ;;  %p659_p10 = scmp.ge.s32.totalorder %s1025_s23, 1 }
  0x14   : > { %s1525_s28 = scalar_select %p1117_p7, 1, 0 }
  0x15   : > { %s1526_s29 = scalar_select %p1121_p8, 1, 0 }
  0x16   : > { %p1125_p9 = por %p170_p6, %p110_p2  ;;  %p205_p11 = scmp.lt.s32.totalorder %s1025_s23, 3 }
  0x17   : > { %s1027_s7 = smov [#allocation2]   ;;  %p727_p1 = scmp.lt.s32.totalorder %s1025_s23, 2 }
  0x18   : > { %s1527_s30 = scalar_select %p1125_p9, 1, 0 }
  0x19   : > { %p1131_p12 = pnand %p659_p10, %p205_p11  ;;  %s220_s8 = sshll.u32 %s1027_s7, 4  ;;  %s1135_s8 = int_to_ptr.vmem [resolvable:$true] %s220_s8 }
  0x1a   : > { %1528 = sst [smem:[#allocation19_spill]] %s1527_s30  ;;  %p1149_p4 = pnand %p727_p1, %p1111_p5 }
  0x1b   : > { %s1529_s6 = scalar_select %p1131_p12, 1, 0 }
  0x1c   : > { %p704_p13 = pneg %p1131_p12  ;;  %s33_s11 = sadd.s32 1, %s1021_s22 }
  0x1d   : > { %s1531_s10 = scalar_select %p1149_p4, 1, 0 }
  0x1e   : > { %p1143_p2 = pnand %p704_p13, %p1504_p3  ;;  %p1154_p6 = scmp.ge.s32.totalorder %s33_s11, 2 }
  0x1f   : > { %s1533_s0 = sld [smem:[#allocation22_spill]] }
  0x20   : > { %p1512_p11 = pneg %p1143_p2 }
  0x25   : > { %s787_s15 = scalar_lea.hbm %s1533_s0, 512 }
  0x26   : > { %p788_p10 = scmp.ne.s32.totalorder %s1533_s0, %s787_s15  ;;  %p794_p1 = scmp.lt.u32.totalorder %s787_s15, %s1533_s0 }
  0x28   : > { %p790_p5 = pnand %p1512_p11, %p788_p10 }
  0x2a   : > { %p791_p13 = pneg %p790_p5 }
  0x2c   : > { %p796_p0 = pnand %p794_p1, %p791_p13 }
  0x2e   : > { %799 = shalt.err (!%p796_p0)
}
  0x2f   : > { %s800_s7 = scalar_lea.vmem %s1135_s8, 512  ;;  %p808_p7 = scmp.lt.s32.totalorder %s1135_s8, %s1135_s8 }
  0x30   : > { %p801_p3 = scmp.ne.s32.totalorder %s1135_s8, %s800_s7  ;;  %p809_p10 = scmp.lt.s32.totalorder %s800_s7, %s800_s7 }
  0x32   : > { %p803_p9 = pnand %p801_p3, %p1512_p11  ;;  %p810_p5 = por %p809_p10, %p808_p7 }
  0x34   : > { %p804_p8 = pneg %p803_p9 }
  0x36   : > { %p811_p12 = pnand %p810_p5, %p804_p8 }
  0x38   : > { %814 = shalt.err (!%p811_p12)
}
  0x39   : > { %s1028_s13 = smov 128   ;;  %s1029_s14 = smov 8  }
  0x3a   : > { %707 = dma.hbm_to_vmem [thread:$0]  (!%p1143_p2), %s1533_s0, 512, %s1135_s8, [#allocation3], %s1028_s13, %s1028_s13, %s1029_s14  }
  0x3b   : > { %s250_s17 = sand.u32 1, %s1025_s23   ;;  %s1567_s11 = smov (%p1154_p6, %s33_s11), 0 }
  0x3c   : > { %1534 = sst [smem:[#allocation20_spill]] %s1567_s11  ;;  %s252_s25 = sand.u32 1, %s1013_s20  }
  0x3d   : > { %s94_s27 = ssub.s32 %s1021_s22, %s1567_s11  ;;  %s1196_s7 = sshll.u32 %s252_s25, 5 }
  0x3e   : > { %p95_p3 = scmp.eq.s32.totalorder %s94_s27, 0  ;;  %s684_s26 = sshll.u32 %s1021_s22, 9 }
  0x3f   : > { %s254_s30 = scalar_lea.vmem [#allocation7], %s1196_s7  ;;  %s1535_s5 = sadd.s32 1, %s1013_s20 }
  0x40   : > { %s262_s18 = sshll.u32 %s254_s30, 4  ;;  %s1537_s2 = sld [smem:[#allocation23_spill]]  ;;  %s1212_s18 = int_to_ptr.vmem [resolvable:$true] %s262_s18 }
  0x41   : > { %s1203_s4 = scalar_select %p95_p3, %s1013_s20, %s1535_s5  }
  0x42   : > { %s1214_s16 = scalar_lea.sflag [#allocation3], %s250_s17  ;;  %p1515_p8 = pneg %p1149_p4 }
  0x43   : > { %1536 = sst [smem:[#allocation21_spill]] %s1203_s4 }
  0x46   : > { %s1210_s12 = scalar_lea.hbm %s1537_s2, %s684_s26  ;;  %s820_s27 = scalar_lea.hbm %s1537_s2, 1024 }
  0x47   : > { %s815_s25 = scalar_lea.hbm %s1210_s12, 512  ;;  %p821_p0 = scmp.lt.u32.totalorder %s1210_s12, %s1537_s2 }
  0x48   : > { %p816_p7 = scmp.ne.s32.totalorder %s1210_s12, %s815_s25  ;;  %p822_p6 = scmp.lt.u32.totalorder %s820_s27, %s815_s25 }
  0x49   : > { %p824_p1 = scmp.lt.u32.totalorder %s815_s25, %s1210_s12 }
  0x4a   : > { %p818_p9 = pnand %p1515_p8, %p816_p7  ;;  %p823_p13 = por %p822_p6, %p821_p0 }
  0x4c   : > { %p819_p12 = pneg %p818_p9  ;;  %p825_p10 = por %p824_p1, %p823_p13 }
  0x4e   : > { %p826_p5 = pnand %p825_p10, %p819_p12 }
  0x50   : > { %829 = shalt.err (!%p826_p5)
}
  0x51   : > { %s830_s17 = scalar_lea.vmem %s1212_s18, 512  ;;  %s1030_s5 = smov [#allocation7]  }
  0x52   : > { %p831_p3 = scmp.ne.s32.totalorder %s1212_s18, %s830_s17  ;;  %s835_s30 = sshll.u32 %s1030_s5, 4  ;;  %s836_s30 = int_to_ptr.vmem [resolvable:$false] %s835_s30 }
  0x53   : > { %s837_s8 = scalar_lea.vmem %s836_s30, 1024  ;;  %p838_p11 = scmp.lt.s32.totalorder %s1212_s18, %s836_s30 }
  0x54   : > { %p833_p7 = pnand %p831_p3, %p1515_p8  ;;  %p839_p0 = scmp.lt.s32.totalorder %s837_s8, %s830_s17 }
  0x56   : > { %p834_p9 = pneg %p833_p7  ;;  %p840_p6 = por %p839_p0, %p838_p11 }
  0x58   : > { %p841_p13 = pnand %p840_p6, %p834_p9 }
  0x5a   : > { %844 = shalt.err (!%p841_p13)
}
  0x5b   : > { %714 = dma.hbm_to_vmem [thread:$0]  (!%p1149_p4), %s1210_s12, 512, %s1212_s18, %s1214_s16, %s1028_s13, %s1028_s13, %s1029_s14  }
  0x5c   : > { %s1031_s25 = smov [#allocation5]   ;;  %s1250_s5 = scalar_lea.hbm %s1501_s3, %s684_s26 }
  0x5d   : > { %s236_s27 = sshll.u32 %s1031_s25, 4  ;;  %s276_s30 = scalar_lea.vmem [#allocation8], %s1196_s7  ;;  %s237_s27 = int_to_ptr.vmem [resolvable:$true] %s236_s27 }
  0x5e   : > { %s284_s8 = sshll.u32 %s276_s30, 4  ;;  %s845_s11 = scalar_lea.hbm %s1499_s1, 512  ;;  %s1276_s8 = int_to_ptr.vmem [resolvable:$true] %s284_s8 }
  0x5f   : > { %p846_p11 = scmp.ne.s32.totalorder %s1499_s1, %s845_s11  ;;  %p1538_p12 = pneg %p1143_p2 }
  0x60   : > { %p852_p5 = scmp.lt.u32.totalorder %s845_s11, %s1499_s1 }
  0x61   : > { %p848_p1 = pnand %p846_p11, %p1538_p12 }
  0x63   : > { %p849_p10 = pneg %p848_p1 }
  0x65   : > { %p854_p3 = pnand %p852_p5, %p849_p10 }
  0x67   : > { %857 = shalt.err (!%p854_p3)
}
  0x68   : > { %s858_s26 = scalar_lea.vmem %s237_s27, 512  ;;  %p1539_p9 = pmov %p1538_p12 }
  0x69   : > { %p859_p7 = scmp.ne.s32.totalorder %s237_s27, %s858_s26  ;;  %p866_p13 = scmp.lt.s32.totalorder %s237_s27, %s237_s27 }
  0x6a   : > { %p867_p8 = scmp.lt.s32.totalorder %s858_s26, %s858_s26 }
  0x6b   : > { %p861_p0 = pnand %p859_p7, %p1539_p9 }
  0x6c   : > { %p868_p4 = por %p867_p8, %p866_p13 }
  0x6d   : > { %p862_p6 = pneg %p861_p0 }
  0x6f   : > { %p869_p11 = pnand %p868_p4, %p862_p6 }
  0x71   : > { %872 = shalt.err (!%p869_p11)
}
  0x72   : > { %710 = dma.hbm_to_vmem [thread:$0]  (!%p1143_p2), %s1499_s1, 512, %s237_s27, [#allocation6], %s1028_s13, %s1028_s13, %s1029_s14  }
  0x73   : > { %s873_s4 = scalar_lea.hbm %s1250_s5, 512  ;;  %p1540_p4 = scmp.ne.s32.totalorder %s1531_s10, 0 }
  0x74   : > { %p874_p8 = scmp.ne.s32.totalorder %s1250_s5, %s873_s4  ;;  %s878_s11 = scalar_lea.hbm %s1501_s3, 1024 }
  0x75   : > { %p1541_p12 = pneg %p1540_p4  ;;  %p879_p5 = scmp.lt.u32.totalorder %s1250_s5, %s1501_s3 }
  0x76   : > { %p880_p3 = scmp.lt.u32.totalorder %s878_s11, %s873_s4  ;;  %p882_p9 = scmp.lt.u32.totalorder %s873_s4, %s1250_s5 }
  0x77   : > { %p876_p1 = pnand %p874_p8, %p1541_p12 }
  0x78   : > { %p881_p7 = por %p880_p3, %p879_p5 }
  0x79   : > { %p877_p10 = pneg %p876_p1 }
  0x7a   : > { %p883_p2 = por %p882_p9, %p881_p7 }
  0x7c   : > { %p884_p0 = pnand %p883_p2, %p877_p10 }
  0x7e   : > { %887 = shalt.err (!%p884_p0)
}
  0x7f   : > { %s888_s27 = scalar_lea.vmem %s1276_s8, 512  ;;  %p1542_p13 = pmov %p1541_p12 }
  0x80   : > { %p889_p6 = scmp.ne.s32.totalorder %s1276_s8, %s888_s27  ;;  %s1032_s15 = smov [#allocation8]  }
  0x81   : > { %s893_s17 = sshll.u32 %s1032_s15, 4  ;;  %s894_s17 = int_to_ptr.vmem [resolvable:$false] %s893_s17 }
  0x82   : > { %p891_p11 = pnand %p889_p6, %p1542_p13  ;;  %s895_s30 = scalar_lea.vmem %s894_s17, 1024 }
  0x83   : > { %p896_p12 = scmp.lt.s32.totalorder %s1276_s8, %s894_s17  ;;  %p897_p1 = scmp.lt.s32.totalorder %s895_s30, %s888_s27 }
  0x84   : > { %p892_p8 = pneg %p891_p11 }
  0x85   : > { %p898_p5 = por %p897_p1, %p896_p12 }
  0x87   : > { %p899_p3 = pnand %p898_p5, %p892_p8 }
  0x89   : > { %902 = shalt.err (!%p899_p3)
}
  0x8a   : > { %717 = dma.hbm_to_vmem [thread:$0]  (!%p1540_p4), %s1250_s5, 512, %s1276_s8, %s1214_s16, %s1028_s13, %s1028_s13, %s1029_s14  }
  0x8b   : > { %p1543_p10 = scmp.ne.s32.totalorder %s1529_s6, 0 }
  0x8c   : > { %p1544_p7 = scmp.eq.s32.totalorder (!%p1543_p10), %s1100_s24, 0 }
  0x8d   : > { %296 = sbr.rel (%p1543_p10) target bundleno = 331 (0x14b), region = 36 }
  0x94   : > { %984 = dma.done.wait (%p1544_p7), [#allocation3], 512   ;;  %p1545_p9 = pmov %p1544_p7 }
  0x95   : > { %p1546_p2 = pmov %p1544_p7 }
  0x96   : > { %986 = vsyncadd (%p1545_p9), [#allocation3], 4294966784 }
  0x97   : > { %988 = dma.done.wait (%p1546_p2), [#allocation6], 512   ;;  %p1547_p0 = pmov %p1546_p2 }
  0x98   : > { %s306_s10 = sand.u32 1, %s1100_s24   ;;  %s1317_s13 = sand.u32 1, %s1009_s19  }
  0x99   : > { %990 = vsyncadd (%p1547_p0), [#allocation6], 4294966784  ;;  %s1320_s6 = sshll.u32 %s1317_s13, 5  ;;  %s307_s14 = scalar_lea.sflag [#allocation3], %s306_s10 }
  0x9a   : > { %s310_s16 = scalar_lea.vmem [#allocation7], %s1320_s6  ;;  %p1548_p4 = scmp.ne.s32.totalorder %s1525_s28, 0 }
  0x9c   : > { %992 = dma.done.wait (%p1548_p4), %s307_s14, 1024  }
  0x9d   : > { %994 = vsyncadd (%p1548_p4), %s307_s14, 4294966272  ;;  %v380_v0 = vld [vmem:[%s310_s16 + $0x10] sm:$0xff]  ;;  %v378_v1 = vld [vmem:[%s310_s16] sm:$0xff]  ;;  %s1033_s5 = smov 112   ;;  %s1034_s24 = smov 16   ;;  %v374_v8 = vlaneseq }
  0x9e   : > { %386 = vrot.lane.b32.xlu1 %v380_v0, %s1033_s5  ;;  %382 = vrot.lane.b32.xlu0 %v378_v1, %s1033_s5  ;;  %v381_v2 = vld [vmem:[%s310_s16 + $0x18] sm:$0xff]  ;;  %v379_v3 = vld [vmem:[%s310_s16 + $0x8] sm:$0xff]  ;;  %s319_s8 = scalar_lea.vmem [#allocation8], %s1320_s6  ;;  %v1344_v15 = vld [vmem:[#allocation2] sm:$0xff]  ;;  %s348_s28 = scalar_lea.vmem [#allocation9], %s1320_s6 }
  0x9f   : > { %v1328_v4 = vld [vmem:[%s319_s8 + $0x8] sm:$0xff]  ;;  %v1330_v5 = vld [vmem:[%s319_s8] sm:$0xff]  ;;  %v1334_v6 = vld [vmem:[%s319_s8 + $0x18] sm:$0xff]  ;;  %v375_v9 = vand.u32 127, %v374_v8  ;;  %v404_v20 = vmul.f32 %v378_v1, %v1344_v15  ;;  %s480_s18 = sshll.u32 %s348_s28, 4  ;;  %s686_s12 = sshll.u32 %s1017_s21, 9  ;;  %s1380_s18 = int_to_ptr.vmem [resolvable:$true] %s480_s18 }
  0xa0   : > { %v1336_v7 = vld [vmem:[%s319_s8 + $0x10] sm:$0xff]  ;;  %v1346_v16 = vld [vmem:[#allocation2 + $0x8] sm:$0xff]  ;;  %v1354_v19 = vld [vmem:[#allocation5] sm:$0xff]  ;;  %s1551_s2 = sld [smem:[#allocation24_spill]]  ;;  %s461_s20 = scalar_lea.sflag [#allocation4], %s1317_s13 }
  0xa1   : > { %v376_v12 = vand.u32 31, %v375_v9  ;;  %v1352_v18 = vld [vmem:[#allocation5 + $0x8] sm:$0xff]  ;;  %v405_v21 = vmul.f32 %v379_v3, %v1346_v16  ;;  %v1358_v24 = vld [vmem:[#allocation2 + $0x10] sm:$0xff]  ;;  %v1360_v25 = vld [vmem:[#allocation2 + $0x18] sm:$0xff]  ;;  %s903_s9 = scalar_lea.vmem %s1380_s18, 512  ;;  %p1552_p13 = scmp.ne.s32.totalorder %s1526_s29, 0 }
  0xa2   : > { %388 = vrot.lane.b32.xlu1 %v381_v2, %s1033_s5  ;;  %384 = vrot.lane.b32.xlu0 %v379_v3, %s1033_s5  ;;  %v1369_v30 = vld [vmem:[#allocation5 + $0x18] sm:$0xff]  ;;  %v1371_v31 = vld [vmem:[#allocation5 + $0x10] sm:$0xff]  ;;  %v406_v32 = vmul.f32 %v380_v0, %v1358_v24  ;;  %v407_v33 = vmul.f32 %v381_v2, %v1360_v25  ;;  %p904_p6 = scmp.ne.s32.totalorder %s1380_s18, %s903_s9  ;;  %s1035_s11 = smov [#allocation9]  }
  0xa3   : > { %vm1348_vm0 = vcmp.lt.s32.totalorder %v376_v12, 16  ;;  %s907_s7 = sshll.u32 %s1035_s11, 4  ;;  %s908_s7 = int_to_ptr.vmem [resolvable:$false] %s907_s7 }
  0xa4   : > { %p905_p11 = pnand %p904_p6, %p1552_p13  ;;  %s909_s25 = scalar_lea.vmem %s908_s7, 1024 }
  0xa5   : > { %p910_p12 = scmp.lt.s32.totalorder %s1380_s18, %s908_s7  ;;  %p911_p1 = scmp.lt.s32.totalorder %s909_s25, %s903_s9 }
  0xa6   : > { %392 = vrot.lane.b32.xlu1 %v379_v3, %s1034_s24  ;;  %390 = vrot.lane.b32.xlu0 %v378_v1, %s1034_s24  ;;  %s1389_s4 = scalar_lea.hbm %s1551_s2, %s686_s12  ;;  %p906_p8 = pneg %p905_p11 }
  0xa7   : > { %p912_p5 = por %p911_p1, %p910_p12 }
  0xa9   : > { %p913_p3 = pnand %p912_p5, %p906_p8 }
  0xaa   : > { %396 = vrot.lane.b32.xlu1 %v381_v2, %s1034_s24  ;;  %394 = vrot.lane.b32.xlu0 %v380_v0, %s1034_s24 }
  0xae   : > { %426 = vrot.lane.b32.xlu1 %v1328_v4, %s1033_s5  ;;  %424 = vrot.lane.b32.xlu0 %v1330_v5, %s1033_s5 }
  0xb2   : > { %430 = vrot.lane.b32.xlu1 %v1334_v6, %s1033_s5  ;;  %428 = vrot.lane.b32.xlu0 %v1336_v7, %s1033_s5 }
  0xb6   : > { %434 = vrot.lane.b32.xlu1 %v1328_v4, %s1034_s24  ;;  %432 = vrot.lane.b32.xlu0 %v1330_v5, %s1034_s24 }
  0xba   : > { %438 = vrot.lane.b32.xlu1 %v1334_v6, %s1034_s24  ;;  %436 = vrot.lane.b32.xlu0 %v1336_v7, %s1034_s24 }
 0x110   : > { %v387_v10 = vpop.permute.xlu1 %386  ;;  %v383_v11 = vpop.permute.xlu0 %382 }
 0x114   : > { %v389_v13 = vpop.permute.xlu1 %388  ;;  %v385_v14 = vpop.permute.xlu0 %384 }
 0x118   : > { %v393_v22 = vpop.permute.xlu1 %392  ;;  %v391_v23 = vpop.permute.xlu0 %390 }
 0x119   : > { %v401_v26 = vsel %vm1348_vm0, %v385_v14, %v393_v22  ;;  %v400_v27 = vsel %vm1348_vm0, %v383_v11, %v391_v23 }
 0x11a   : > { %v409_v28 = vmul.f32 %v401_v26, %v1352_v18  ;;  %v408_v29 = vmul.f32 %v400_v27, %v1354_v19 }
 0x11c   : > { %v413_v34 = vadd.f32 %v409_v28, %v405_v21  ;;  %v412_v35 = vadd.f32 %v408_v29, %v404_v20  ;;  %v397_v36 = vpop.permute.xlu1 %396  ;;  %v395_v37 = vpop.permute.xlu0 %394 }
 0x11d   : > { %v403_v38 = vsel %vm1348_vm0, %v389_v13, %v397_v36  ;;  %v402_v39 = vsel %vm1348_vm0, %v387_v10, %v395_v37 }
 0x11e   : > { %417 = vst [vmem:[%s348_s28 + $0x8] sm:$0xff] %v413_v34  ;;  %416 = vst [vmem:[%s348_s28] sm:$0xff] %v412_v35  ;;  %v411_v40 = vmul.f32 %v403_v38, %v1369_v30  ;;  %v410_v41 = vmul.f32 %v402_v39, %v1371_v31 }
 0x120   : > { %v415_v42 = vadd.f32 %v411_v40, %v407_v33  ;;  %v414_v43 = vadd.f32 %v410_v41, %v406_v32  ;;  %v427_v44 = vpop.permute.xlu1 %426  ;;  %v425_v45 = vpop.permute.xlu0 %424 }
 0x122   : > { %419 = vst [vmem:[%s348_s28 + $0x18] sm:$0xff] %v415_v42  ;;  %418 = vst [vmem:[%s348_s28 + $0x10] sm:$0xff] %v414_v43 }
 0x123   : > { %916 = shalt.err (!%p913_p3)
}
 0x124   : > { %s917_s27 = scalar_lea.hbm %s1389_s4, 512  ;;  %s921_s30 = scalar_lea.hbm %s1551_s2, 1024 }
 0x125   : > { %p918_p10 = scmp.ne.s32.totalorder %s1389_s4, %s917_s27  ;;  %p922_p2 = scmp.lt.u32.totalorder %s1389_s4, %s1551_s2 }
 0x126   : > { %p923_p0 = scmp.lt.u32.totalorder %s921_s30, %s917_s27  ;;  %p925_p6 = scmp.lt.u32.totalorder %s917_s27, %s1389_s4 }
 0x127   : > { %p919_p7 = pnand %p918_p10, %p1552_p13 }
 0x128   : > { %p924_p4 = por %p923_p0, %p922_p2 }
 0x129   : > { %p920_p9 = pneg %p919_p7 }
 0x12a   : > { %p926_p11 = por %p925_p6, %p924_p4 }
 0x12c   : > { %p927_p8 = pnand %p926_p11, %p920_p9 }
 0x12e   : > { %930 = shalt.err (!%p927_p8)
}
 0x12f   : > { %s1036_s16 = smov 128   ;;  %s1037_s5 = smov 8   ;;  %v431_v46 = vpop.permute.xlu1 %430  ;;  %v429_v47 = vpop.permute.xlu0 %428  ;;  %v445_v48 = vmul.f32 %v1328_v4, %v1346_v16  ;;  %v444_v49 = vmul.f32 %v1330_v5, %v1344_v15  ;;  %v447_v56 = vmul.f32 %v1334_v6, %v1360_v25  ;;  %v446_v57 = vmul.f32 %v1336_v7, %v1358_v24 }
 0x130   : > { %700 = dma.vmem_to_hbm [thread:$0]  (%p1552_p13), %s1380_s18, 512, %s1389_s4, %s461_s20, %s1036_s16, %s1036_s16, %s1037_s5  }
 0x131   : > { %s355_s24 = scalar_lea.vmem [#allocation10], %s1320_s6  ;;  %s1553_s18 = sld [smem:[#allocation25_spill]] }
 0x132   : > { %s497_s8 = sshll.u32 %s355_s24, 4  ;;  %s466_s4 = scalar_lea.sflag [#allocation11], %s1317_s13  ;;  %s1439_s8 = int_to_ptr.vmem [resolvable:$true] %s497_s8 }
 0x133   : > { %v435_v50 = vpop.permute.xlu1 %434  ;;  %v433_v51 = vpop.permute.xlu0 %432  ;;  %s931_s20 = scalar_lea.vmem %s1439_s8, 512  ;;  %s1038_s9 = smov [#allocation10]  }
 0x134   : > { %v441_v52 = vsel %vm1348_vm0, %v427_v44, %v435_v50  ;;  %v440_v53 = vsel %vm1348_vm0, %v425_v45, %v433_v51  ;;  %p932_p12 = scmp.ne.s32.totalorder %s1439_s8, %s931_s20  ;;  %s935_s11 = sshll.u32 %s1038_s9, 4  ;;  %s936_s11 = int_to_ptr.vmem [resolvable:$false] %s935_s11 }
 0x135   : > { %v449_v54 = vmul.f32 %v441_v52, %v1352_v18  ;;  %v448_v55 = vmul.f32 %v440_v53, %v1354_v19  ;;  %s937_s7 = scalar_lea.vmem %s936_s11, 1024  ;;  %p938_p3 = scmp.lt.s32.totalorder %s1439_s8, %s936_s11 }
 0x136   : > { %p933_p1 = pnand %p932_p12, %p1552_p13  ;;  %p939_p10 = scmp.lt.s32.totalorder %s937_s7, %s931_s20 }
 0x137   : > { %v453_v58 = vadd.f32 %v449_v54, %v445_v48  ;;  %v452_v59 = vadd.f32 %v448_v55, %v444_v49  ;;  %v439_v60 = vpop.permute.xlu1 %438  ;;  %v437_v61 = vpop.permute.xlu0 %436  ;;  %s1554_s26 = smov %s1553_s18  ;;  %s1446_s0 = scalar_lea.hbm %s1553_s18, %s686_s12 }
 0x138   : > { %v443_v62 = vsel %vm1348_vm0, %v431_v46, %v439_v60  ;;  %v442_v63 = vsel %vm1348_vm0, %v429_v47, %v437_v61  ;;  %p934_p5 = pneg %p933_p1  ;;  %p940_p7 = por %p939_p10, %p938_p3 }
 0x139   : > { %457 = vst [vmem:[%s355_s24 + $0x8] sm:$0xff] %v453_v58  ;;  %456 = vst [vmem:[%s355_s24] sm:$0xff] %v452_v59  ;;  %v451_v0 = vmul.f32 %v443_v62, %v1369_v30  ;;  %v450_v1 = vmul.f32 %v442_v63, %v1371_v31 }
 0x13a   : > { %p941_p9 = pnand %p940_p7, %p934_p5 }
 0x13b   : > { %v455_v2 = vadd.f32 %v451_v0, %v447_v56  ;;  %v454_v3 = vadd.f32 %v450_v1, %v446_v57 }
 0x13d   : > { %459 = vst [vmem:[%s355_s24 + $0x18] sm:$0xff] %v455_v2  ;;  %458 = vst [vmem:[%s355_s24 + $0x10] sm:$0xff] %v454_v3 }
 0x13e   : > { %944 = shalt.err (!%p941_p9)
}
 0x13f   : > { %s945_s21 = scalar_lea.hbm %s1446_s0, 512  ;;  %s949_s27 = scalar_lea.hbm %s1554_s26, 1024 }
 0x140   : > { %p946_p2 = scmp.ne.s32.totalorder %s1446_s0, %s945_s21  ;;  %p950_p6 = scmp.lt.u32.totalorder %s1446_s0, %s1554_s26 }
 0x141   : > { %p951_p11 = scmp.lt.u32.totalorder %s949_s27, %s945_s21  ;;  %p953_p12 = scmp.lt.u32.totalorder %s945_s21, %s1446_s0 }
 0x142   : > { %p947_p0 = pnand %p946_p2, %p1552_p13 }
 0x143   : > { %p952_p8 = por %p951_p11, %p950_p6 }
 0x144   : > { %p948_p4 = pneg %p947_p0 }
 0x145   : > { %p954_p1 = por %p953_p12, %p952_p8 }
 0x147   : > { %p955_p5 = pnand %p954_p1, %p948_p4 }
 0x149   : > { %958 = shalt.err (!%p955_p5)
}
 0x14a   : > { %701 = dma.vmem_to_hbm [thread:$0]  (%p1552_p13), %s1439_s8, 512, %s1446_s0, %s466_s4, %s1036_s16, %s1036_s16, %s1037_s5  }
 0x14b PF: > { %s1555_s30 = sld [smem:[#allocation17_spill]]  ;;  %s1556_s10 = sld [smem:[#allocation19_spill]] }
 0x14c   : > { %p1558_p10 = scmp.ge.s32.totalorder %s1025_s23, 2 }
 0x151   : > { %s512_s14 = sand.u32 1, %s1555_s30   ;;  %p1557_p3 = scmp.ne.s32.totalorder %s1556_s10, 0 }
 0x152   : > { %s513_s24 = scalar_lea.sflag [#allocation4], %s512_s14 }
 0x153   : > { %p719_p7 = pnand %p1558_p10, %p1557_p3 }
 0x155   : > { %996 = dma.done.wait (!%p719_p7), %s513_s24, 512  }
 0x156   : > { %998 = vsyncadd (!%p719_p7), %s513_s24, 4294966784  ;;  %s522_s29 = scalar_lea.sflag [#allocation11], %s512_s14 }
 0x157   : > { %1000 = dma.done.wait (!%p719_p7), %s522_s29, 512  }
 0x158   : > { %1002 = vsyncadd (!%p719_p7), %s522_s29, 4294966784  ;;  %s24_s23 = sadd.s32 1, %s1025_s23   ;;  %s1559_s13 = sld [smem:[#allocation18_spill]] }
 0x159   : > { %p21_p9 = scmp.ge.s32.totalorder %s24_s23, 4   ;;  %s1560_s20 = sld [smem:[#allocation21_spill]] }
 0x15a   : > { %s1561_s16 = sld [smem:[#allocation20_spill]]  ;;  %s1562_s18 = smov %s1009_s19 }
 0x15b   : > { %s1564_s21 = smov %s1021_s22  ;;  %23 = sbr.rel (!%p21_p9) target bundleno = 13 (0xd), region = 118 }
 0x15e   : > { %s1563_s19 = smov %s1559_s13 }
 0x160   : > { %s1565_s22 = smov %s1561_s16 }
 0x162   :  { %527 = vsyncpa [#allocation3], 1 }
 0x163   :  { %529 = vsyncpa [#allocation3 + $0x1], 1 }
 0x164   :  { %530 = vsyncpa [#allocation6], 1 }
 0x165   :  { %531 = vsyncpa [#allocation4], 1 }
 0x166   :  { %533 = vsyncpa [#allocation4 + $0x1], 1 }
 0x167   :  { %534 = vsyncpa [#allocation11], 1 }
 0x168   :  { %536 = vsyncpa [#allocation11 + $0x1], 1 }

</bundles_post_ra>
